<compile_context>
chip_gen: v7x
topology: tpu7x:2x2x1
jax: 0.10.0
libtpu: 0.0.40
codegen_flags: <defaults>
</compile_context>

<pallas_src>
import functools

import numpy as np

import jax
import jax.numpy as jnp
from jax import lax
from jax.experimental import pallas as pl
from jax.experimental.pallas import tpu as pltpu


def _round_up(x, m):
    return (x + m - 1) // m * m


# ----------------------------------------------------------------------------
# One-time weight packing (host side, outside the jitted per-call path)
# ----------------------------------------------------------------------------
def _pack_conv_lane_matrices(w, w_in):
    """OIHW 3x3 conv weight -> kh banded lane matrices.

    m[di][wi*cin + c, wo*cout + co] = w[co, c, di, wi - wo]  (0 <= wi - wo < kw)
    so that  out_row[r] = sum_di  in_row[r + di] @ m[di]
    is a VALID cross-correlation over the (column, channel) lane layout.
    """
    cout, cin, kh, kw = w.shape
    w_out = w_in - kw + 1
    wnp = np.asarray(w, np.float32)
    m = np.zeros((kh, w_in * cin, w_out * cout), np.float32)
    for di in range(kh):
        for wo in range(w_out):
            for dj in range(kw):
                wi = wo + dj
                m[di, wi * cin:(wi + 1) * cin,
                  wo * cout:(wo + 1) * cout] = wnp[:, :, di, dj].T
    return m


def _pack_pool_selectors(w_in, c):
    """0/1 lane selectors picking even / odd pooling columns (w_in -> w_in//2)."""
    w_out = w_in // 2
    s = np.zeros((2, w_in * c, w_out * c), np.float32)
    for par in range(2):
        for wo in range(w_out):
            for ch in range(c):
                s[par, (2 * wo + par) * c + ch, wo * c + ch] = 1.0
    return s


def pack_params(p, h, w):
    """Pack PyTorch-layout PNet params into DMA-ready GEMM operands."""
    assert h % 2 == 0 and w % 2 == 0 and h >= 12 and w >= 12
    c1, c3, chead = 10, 32, 15
    w1o = w - 2                 # conv1 output width
    wp = w1o // 2               # pooled width
    w2o = wp - 2                # conv2 output width
    w3o = w2o - 2               # conv3 / head output width

    whead = np.concatenate(
        [np.asarray(p["wc"], np.float32).reshape(1, 32),
         np.asarray(p["wo"], np.float32).reshape(4, 32),
         np.asarray(p["wl"], np.float32).reshape(10, 32)], axis=0)   # (15, 32)
    mh = np.zeros((w3o * c3, w3o * chead), np.float32)
    for col in range(w3o):
        mh[col * c3:(col + 1) * c3, col * chead:(col + 1) * chead] = whead.T
    bhead = np.concatenate([np.asarray(p["bc"]), np.asarray(p["bo"]),
                            np.asarray(p["bl"])]).astype(np.float32)  # (15,)

    return {
        "m1": jnp.asarray(_pack_conv_lane_matrices(p["w1"], w)),      # (3, 48, 140)
        "m2": jnp.asarray(_pack_conv_lane_matrices(p["w2"], wp)),     # (3, 70, 80)
        "m3": jnp.asarray(_pack_conv_lane_matrices(p["w3"], w2o)),    # (3, 80, 96)
        "mh": jnp.asarray(mh),                                        # (96, 45)
        "sp": jnp.asarray(_pack_pool_selectors(w1o, c1)),             # (2, 140, 70)
        "b1": jnp.asarray(np.tile(np.asarray(p["b1"], np.float32), w1o)).reshape(1, -1),
        "b2": jnp.asarray(np.tile(np.asarray(p["b2"], np.float32), w2o)).reshape(1, -1),
        "b3": jnp.asarray(np.tile(np.asarray(p["b3"], np.float32), w3o)).reshape(1, -1),
        "bh": jnp.asarray(np.tile(bhead, w3o)).reshape(1, -1),
        "alpha": jnp.stack([p["a1"], p["a2"], p["a3"]]).astype(jnp.float32),  # SMEM
    }


# ----------------------------------------------------------------------------
# Fused Pallas kernel: whole PNet forward for one batch tile
# ----------------------------------------------------------------------------
def _pnet_fused_kernel(x_ref, m1_ref, m2_ref, m3_ref, mh_ref, sp_ref,
                       b1_ref, b2_ref, b3_ref, bh_ref, alpha_ref, o_ref,
                       *, nb, h, w):
    f32 = jnp.float32
    dot = functools.partial(jnp.dot, preferred_element_type=f32)

    def prelu(z, a):
        return jnp.where(z >= 0, z, a * z)

    hh = h // 2                      # rows per image after the 2x2 pool
    wp = (w - 2) // 2                # pooled width
    w3o = wp - 4                     # conv3 / head output width
    r1 = nb * h - 2                  # conv1 rows computed this step
    ra2 = nb * hh + 4                # pooled rows (with shift padding)
    rz2 = nb * hh + 2                # conv2 rows (with shift padding)
    rz3 = nb * hh                    # conv3 / head rows (== output block rows)

    x = x_ref[...]                                            # (nb*h, w*3)

    # conv1 (3x3, valid): 3 banded matmuls over row-shifted windows + PReLU.
    z1 = dot(x[0:r1, :], m1_ref[0])
    z1 = z1 + dot(x[1:r1 + 1, :], m1_ref[1])
    z1 = z1 + dot(x[2:r1 + 2, :], m1_ref[2])
    z1 = prelu(z1 + b1_ref[...], alpha_ref[0])                # (r1, (w-2)*10)

    # 2x2 / stride-2 max pool: exact 0/1 selection matmuls + jnp.maximum.
    io = lax.broadcasted_iota(jnp.int32, (ra2, r1), 0)
    jo = lax.broadcasted_iota(jnp.int32, (ra2, r1), 1)
    p_even = (jo == 2 * io).astype(f32)
    p_odd = (jo == 2 * io + 1).astype(f32)
    row_max = jnp.maximum(dot(p_even, z1), dot(p_odd, z1))    # (ra2, (w-2)*10)
    pooled = jnp.maximum(dot(row_max, sp_ref[0]),
                         dot(row_max, sp_ref[1]))             # (ra2, wp*10)

    # conv2 (3x3, valid) + PReLU.
    z2 = dot(pooled[0:rz2, :], m2_ref[0])
    z2 = z2 + dot(pooled[1:rz2 + 1, :], m2_ref[1])
    z2 = z2 + dot(pooled[2:rz2 + 2, :], m2_ref[2])
    z2 = prelu(z2 + b2_ref[...], alpha_ref[1])                # (rz2, (wp-2)*16)

    # conv3 (3x3, valid) + PReLU.
    z3 = dot(z2[0:rz3, :], m3_ref[0])
    z3 = z3 + dot(z2[1:rz3 + 1, :], m3_ref[1])
    z3 = z3 + dot(z2[2:rz3 + 2, :], m3_ref[2])
    z3 = prelu(z3 + b3_ref[...], alpha_ref[2])                # (rz3, w3o*32)

    # Fused heads: one (w3o*32 -> w3o*15) GEMM; sigmoid on the cls lanes only.
    zh = dot(z3, mh_ref[...]) + bh_ref[...]                   # (rz3, w3o*15)
    lane = lax.broadcasted_iota(jnp.int32, zh.shape, 1)
    is_cls = lane == 0
    for k in range(1, w3o):
        is_cls = jnp.logical_or(is_cls, lane == 15 * k)
    o_ref[...] = jnp.where(is_cls, 1.0 / (1.0 + jnp.exp(-zh)), zh)


# ----------------------------------------------------------------------------
# Wrapper: layout glue around the single pallas_call
# ----------------------------------------------------------------------------
def pnet_forward_pallas(x_nchw, packed, *, block_n=8):
    n, cin, h, w = x_nchw.shape
    assert cin == 3 and h % 2 == 0 and w % 2 == 0 and h >= 12 and w >= 12
    assert packed["m1"].shape[1] == w * 3, "packed params built for another size"

    hh = h // 2
    h3o = (h - 2) // 2 - 4                 # output height (3 for h=16)
    w3o = (w - 2) // 2 - 4                 # output width  (3 for w=16)
    lanes_out = w3o * 15

    nb = min(block_n, n)                   # images per grid step
    n_pad = _round_up(n, nb)

    # NCHW -> lane-dense slab: rows = (image, row), lanes = (column, channel).
    x = jnp.transpose(x_nchw, (0, 2, 3, 1)).astype(jnp.float32).reshape(n * h, w * 3)
    if n_pad > n:
        x = jnp.pad(x, ((0, (n_pad - n) * h), (0, 0)))

    kernel = functools.partial(_pnet_fused_kernel, nb=nb, h=h, w=w)
    out = pl.pallas_call(
        kernel,
        grid=(n_pad // nb,),
        in_specs=[
            pl.BlockSpec((nb * h, w * 3), lambda i: (i, 0)),
            pl.BlockSpec(packed["m1"].shape, lambda i: (0, 0, 0)),
            pl.BlockSpec(packed["m2"].shape, lambda i: (0, 0, 0)),
            pl.BlockSpec(packed["m3"].shape, lambda i: (0, 0, 0)),
            pl.BlockSpec(packed["mh"].shape, lambda i: (0, 0)),
            pl.BlockSpec(packed["sp"].shape, lambda i: (0, 0, 0)),
            pl.BlockSpec(packed["b1"].shape, lambda i: (0, 0)),
            pl.BlockSpec(packed["b2"].shape, lambda i: (0, 0)),
            pl.BlockSpec(packed["b3"].shape, lambda i: (0, 0)),
            pl.BlockSpec(packed["bh"].shape, lambda i: (0, 0)),
            pl.BlockSpec(memory_space=pltpu.MemorySpace.SMEM),   # PReLU alphas
        ],
        out_specs=pl.BlockSpec((nb * hh, lanes_out), lambda i: (i, 0)),
        out_shape=jax.ShapeDtypeStruct((n_pad * hh, lanes_out), jnp.float32),
        compiler_params=pltpu.CompilerParams(
            dimension_semantics=("parallel",)),
    )(x, packed["m1"], packed["m2"], packed["m3"], packed["mh"], packed["sp"],
      packed["b1"], packed["b2"], packed["b3"], packed["bh"], packed["alpha"])

    # Only rows (image, h3 < h3o) are valid; the rest is shift/pool padding.
    out = out.reshape(n_pad, hh, w3o, 15)[:n, :h3o]          # (N, H3, W3, 15)
    cls = jnp.transpose(out[..., 0:1], (0, 3, 1, 2))
    off = jnp.transpose(out[..., 1:5], (0, 3, 1, 2))
    land = jnp.transpose(out[..., 5:15], (0, 3, 1, 2))
    return cls, off, land


# ----------------------------------------------------------------------------
# Pure-JAX reference + params
# ----------------------------------------------------------------------------
def pnet_forward_ref(x, p):
    def conv(x, w, b):
        y = lax.conv_general_dilated(x, w, (1, 1), "VALID",
                                     dimension_numbers=("NCHW", "OIHW", "NCHW"))
        return y + b[None, :, None, None]

    def prelu(x, a):
        return jnp.where(x >= 0, x, a * x)

    y = prelu(conv(x, p["w1"], p["b1"]), p["a1"])
    y = lax.reduce_window(y, -jnp.inf, lax.max, (1, 1, 2, 2), (1, 1, 2, 2), "VALID")
    y = prelu(conv(y, p["w2"], p["b2"]), p["a2"])
    y = prelu(conv(y, p["w3"], p["b3"]), p["a3"])
    cls = 1.0 / (1.0 + jnp.exp(-conv(y, p["wc"], p["bc"])))
    off = conv(y, p["wo"], p["bo"])
    land = conv(y, p["wl"], p["bl"])
    return cls, off, land


def init_params(key):
    ks = jax.random.split(key, 12)

    def conv_w(k, cout, cin, kh, kw):
        return 0.1 * jax.random.normal(k, (cout, cin, kh, kw), jnp.float32)

    def conv_b(k, cout):
        return 0.1 * jax.random.normal(k, (cout,), jnp.float32)

    return {
        "w1": conv_w(ks[0], 10, 3, 3, 3), "b1": conv_b(ks[1], 10),
        "a1": jnp.float32(0.25),                      # PReLU default init
        "w2": conv_w(ks[2], 16, 10, 3, 3), "b2": conv_b(ks[3], 16),
        "a2": jnp.float32(0.25),
        "w3": conv_w(ks[4], 32, 16, 3, 3), "b3": conv_b(ks[5], 32),
        "a3": jnp.float32(0.25),
        "wc": conv_w(ks[6], 1, 32, 1, 1), "bc": conv_b(ks[7], 1),
        "wo": conv_w(ks[8], 4, 32, 1, 1), "bo": conv_b(ks[9], 4),
        "wl": conv_w(ks[10], 10, 32, 1, 1), "bl": conv_b(ks[11], 10),
    }


if __name__ == "__main__":
    key = jax.random.PRNGKey(0)
    kx, kp = jax.random.split(key)
    x = jax.random.normal(kx, (2, 3, 16, 16), jnp.float32)   # NCHW, like PyTorch
    params = init_params(kp)

    packed = pack_params(params, 16, 16)          # one-time weight packing
    fwd = jax.jit(pnet_forward_pallas)
    cls, off, land = jax.block_until_ready(fwd(x, packed))

    assert cls.shape == (2, 1, 3, 3)
    assert off.shape == (2, 4, 3, 3)
    assert land.shape == (2, 10, 3, 3)

    rcls, roff, rland = jax.block_until_ready(jax.jit(pnet_forward_ref)(x, params))
    for got, ref in ((cls, rcls), (off, roff), (land, rland)):
        err = float(jnp.max(jnp.abs(got - ref)))
        assert jnp.allclose(got, ref, atol=1e-4, rtol=1e-4), err

    print("KERNEL_OK")
</pallas_src>

<mosaic_0001>
module attributes {stable_mosaic.version = 11 : i64} {
  func.func @_pnet_fused_kernel(%arg0: i32, %arg1: memref<32x48xf32, #tpu.memory_space<vmem>>, %arg2: memref<3x48x140xf32, #tpu.memory_space<vmem>>, %arg3: memref<3x70x80xf32, #tpu.memory_space<vmem>>, %arg4: memref<3x80x96xf32, #tpu.memory_space<vmem>>, %arg5: memref<96x45xf32, #tpu.memory_space<vmem>>, %arg6: memref<2x140x70xf32, #tpu.memory_space<vmem>>, %arg7: memref<1x140xf32, #tpu.memory_space<vmem>>, %arg8: memref<1x80xf32, #tpu.memory_space<vmem>>, %arg9: memref<1x96xf32, #tpu.memory_space<vmem>>, %arg10: memref<1x45xf32, #tpu.memory_space<vmem>>, %arg11: memref<3xf32, #tpu.memory_space<smem>>, %arg12: memref<16x45xf32, #tpu.memory_space<vmem>>) attributes {dimension_semantics = [#tpu.dimension_semantics<parallel>], iteration_bounds = array<i64: 1>, scalar_prefetch = 0 : i64, scratch_operands = 0 : i64, tpu.core_type = #tpu.core_type<tc>, window_params = [{transform_indices = @transform_0, window_bounds = array<i64: 32, 48>}, {pipeline_mode = #tpu.pipeline_mode<synchronous>, transform_indices = @transform_1, window_bounds = array<i64: 3, 48, 140>}, {pipeline_mode = #tpu.pipeline_mode<synchronous>, transform_indices = @transform_2, window_bounds = array<i64: 3, 70, 80>}, {pipeline_mode = #tpu.pipeline_mode<synchronous>, transform_indices = @transform_3, window_bounds = array<i64: 3, 80, 96>}, {pipeline_mode = #tpu.pipeline_mode<synchronous>, transform_indices = @transform_4, window_bounds = array<i64: 96, 45>}, {pipeline_mode = #tpu.pipeline_mode<synchronous>, transform_indices = @transform_5, window_bounds = array<i64: 2, 140, 70>}, {pipeline_mode = #tpu.pipeline_mode<synchronous>, transform_indices = @transform_6, window_bounds = array<i64: 1, 140>}, {pipeline_mode = #tpu.pipeline_mode<synchronous>, transform_indices = @transform_7, window_bounds = array<i64: 1, 80>}, {pipeline_mode = #tpu.pipeline_mode<synchronous>, transform_indices = @transform_8, window_bounds = array<i64: 1, 96>}, {pipeline_mode = #tpu.pipeline_mode<synchronous>, transform_indices = @transform_9, window_bounds = array<i64: 1, 45>}, {transform_indices = @transform_10, window_bounds = array<i64: 3>}, {transform_indices = @transform_11, window_bounds = array<i64: 16, 45>}]} {
    %c0 = arith.constant 0 : index
    %c0_0 = arith.constant 0 : index
    %0 = vector.load %arg1[%c0, %c0_0] : memref<32x48xf32, #tpu.memory_space<vmem>>, vector<32x48xf32>
    %1 = vector.extract_strided_slice %0 {offsets = [0, 0], sizes = [30, 48], strides = [1, 1]} : vector<32x48xf32> to vector<30x48xf32>
    %c0_1 = arith.constant 0 : index
    %c0_2 = arith.constant 0 : index
    %c0_3 = arith.constant 0 : index
    %2 = vector.load %arg2[%c0_1, %c0_2, %c0_3] : memref<3x48x140xf32, #tpu.memory_space<vmem>>, vector<1x48x140xf32>
    %3 = vector.shape_cast %2 : vector<1x48x140xf32> to vector<48x140xf32>
    %cst = arith.constant dense<0.000000e+00> : vector<30x140xf32>
    %4 = tpu.matmul %1, %3, %cst {dimension_numbers = #tpu.dot_dimension_numbers<[1], [0], [0], [1], [0, 0, 1, 1], [], []>} : vector<30x48xf32>, vector<48x140xf32>, vector<30x140xf32> -> vector<30x140xf32>
    %5 = vector.extract_strided_slice %0 {offsets = [1, 0], sizes = [30, 48], strides = [1, 1]} : vector<32x48xf32> to vector<30x48xf32>
    %c1 = arith.constant 1 : index
    %c0_4 = arith.constant 0 : index
    %c0_5 = arith.constant 0 : index
    %6 = vector.load %arg2[%c1, %c0_4, %c0_5] : memref<3x48x140xf32, #tpu.memory_space<vmem>>, vector<1x48x140xf32>
    %7 = vector.shape_cast %6 : vector<1x48x140xf32> to vector<48x140xf32>
    %cst_6 = arith.constant dense<0.000000e+00> : vector<30x140xf32>
    %8 = tpu.matmul %5, %7, %cst_6 {dimension_numbers = #tpu.dot_dimension_numbers<[1], [0], [0], [1], [0, 0, 1, 1], [], []>} : vector<30x48xf32>, vector<48x140xf32>, vector<30x140xf32> -> vector<30x140xf32>
    %9 = arith.addf %4, %8 : vector<30x140xf32>
    %10 = vector.extract_strided_slice %0 {offsets = [2, 0], sizes = [30, 48], strides = [1, 1]} : vector<32x48xf32> to vector<30x48xf32>
    %c2 = arith.constant 2 : index
    %c0_7 = arith.constant 0 : index
    %c0_8 = arith.constant 0 : index
    %11 = vector.load %arg2[%c2, %c0_7, %c0_8] : memref<3x48x140xf32, #tpu.memory_space<vmem>>, vector<1x48x140xf32>
    %12 = vector.shape_cast %11 : vector<1x48x140xf32> to vector<48x140xf32>
    %cst_9 = arith.constant dense<0.000000e+00> : vector<30x140xf32>
    %13 = tpu.matmul %10, %12, %cst_9 {dimension_numbers = #tpu.dot_dimension_numbers<[1], [0], [0], [1], [0, 0, 1, 1], [], []>} : vector<30x48xf32>, vector<48x140xf32>, vector<30x140xf32> -> vector<30x140xf32>
    %14 = arith.addf %9, %13 : vector<30x140xf32>
    %c0_10 = arith.constant 0 : index
    %c0_11 = arith.constant 0 : index
    %15 = vector.load %arg7[%c0_10, %c0_11] : memref<1x140xf32, #tpu.memory_space<vmem>>, vector<1x140xf32>
    %16 = vector.broadcast %15 : vector<1x140xf32> to vector<30x140xf32>
    %17 = arith.addf %14, %16 : vector<30x140xf32>
    %c0_12 = arith.constant 0 : index
    %18 = memref.load %arg11[%c0_12] : memref<3xf32, #tpu.memory_space<smem>>
    %cst_13 = arith.constant 0.000000e+00 : f32
    %19 = vector.broadcast %cst_13 : f32 to vector<30x140xf32>
    %20 = arith.cmpf oge, %17, %19 : vector<30x140xf32>
    %21 = vector.broadcast %18 : f32 to vector<30x140xf32>
    %22 = arith.mulf %21, %17 : vector<30x140xf32>
    %23 = arith.select %20, %17, %22 : vector<30x140xi1>, vector<30x140xf32>
    %24 = tpu.iota {dimensions = array<i32: 0>} : vector<20x30xi32>
    %25 = tpu.iota {dimensions = array<i32: 1>} : vector<20x30xi32>
    %c2_i32 = arith.constant 2 : i32
    %26 = vector.broadcast %c2_i32 : i32 to vector<20x30xi32>
    %27 = arith.muli %26, %24 : vector<20x30xi32>
    %28 = arith.cmpi eq, %25, %27 : vector<20x30xi32>
    %29 = arith.extui %28 : vector<20x30xi1> to vector<20x30xi32>
    %30 = arith.sitofp %29 : vector<20x30xi32> to vector<20x30xf32>
    %c2_i32_14 = arith.constant 2 : i32
    %31 = vector.broadcast %c2_i32_14 : i32 to vector<20x30xi32>
    %32 = arith.muli %31, %24 : vector<20x30xi32>
    %c1_i32 = arith.constant 1 : i32
    %33 = vector.broadcast %c1_i32 : i32 to vector<20x30xi32>
    %34 = arith.addi %32, %33 : vector<20x30xi32>
    %35 = arith.cmpi eq, %25, %34 : vector<20x30xi32>
    %36 = arith.extui %35 : vector<20x30xi1> to vector<20x30xi32>
    %37 = arith.sitofp %36 : vector<20x30xi32> to vector<20x30xf32>
    %cst_15 = arith.constant dense<0.000000e+00> : vector<20x140xf32>
    %38 = tpu.matmul %30, %23, %cst_15 {dimension_numbers = #tpu.dot_dimension_numbers<[1], [0], [0], [1], [0, 0, 1, 1], [], []>} : vector<20x30xf32>, vector<30x140xf32>, vector<20x140xf32> -> vector<20x140xf32>
    %cst_16 = arith.constant dense<0.000000e+00> : vector<20x140xf32>
    %39 = tpu.matmul %37, %23, %cst_16 {dimension_numbers = #tpu.dot_dimension_numbers<[1], [0], [0], [1], [0, 0, 1, 1], [], []>} : vector<20x30xf32>, vector<30x140xf32>, vector<20x140xf32> -> vector<20x140xf32>
    %40 = arith.maximumf %38, %39 : vector<20x140xf32>
    %c0_17 = arith.constant 0 : index
    %c0_18 = arith.constant 0 : index
    %c0_19 = arith.constant 0 : index
    %41 = vector.load %arg6[%c0_17, %c0_18, %c0_19] : memref<2x140x70xf32, #tpu.memory_space<vmem>>, vector<1x140x70xf32>
    %42 = vector.shape_cast %41 : vector<1x140x70xf32> to vector<140x70xf32>
    %cst_20 = arith.constant dense<0.000000e+00> : vector<20x70xf32>
    %43 = tpu.matmul %40, %42, %cst_20 {dimension_numbers = #tpu.dot_dimension_numbers<[1], [0], [0], [1], [0, 0, 1, 1], [], []>} : vector<20x140xf32>, vector<140x70xf32>, vector<20x70xf32> -> vector<20x70xf32>
    %c1_21 = arith.constant 1 : index
    %c0_22 = arith.constant 0 : index
    %c0_23 = arith.constant 0 : index
    %44 = vector.load %arg6[%c1_21, %c0_22, %c0_23] : memref<2x140x70xf32, #tpu.memory_space<vmem>>, vector<1x140x70xf32>
    %45 = vector.shape_cast %44 : vector<1x140x70xf32> to vector<140x70xf32>
    %cst_24 = arith.constant dense<0.000000e+00> : vector<20x70xf32>
    %46 = tpu.matmul %40, %45, %cst_24 {dimension_numbers = #tpu.dot_dimension_numbers<[1], [0], [0], [1], [0, 0, 1, 1], [], []>} : vector<20x140xf32>, vector<140x70xf32>, vector<20x70xf32> -> vector<20x70xf32>
    %47 = arith.maximumf %43, %46 : vector<20x70xf32>
    %48 = vector.extract_strided_slice %47 {offsets = [0, 0], sizes = [18, 70], strides = [1, 1]} : vector<20x70xf32> to vector<18x70xf32>
    %c0_25 = arith.constant 0 : index
    %c0_26 = arith.constant 0 : index
    %c0_27 = arith.constant 0 : index
    %49 = vector.load %arg3[%c0_25, %c0_26, %c0_27] : memref<3x70x80xf32, #tpu.memory_space<vmem>>, vector<1x70x80xf32>
    %50 = vector.shape_cast %49 : vector<1x70x80xf32> to vector<70x80xf32>
    %cst_28 = arith.constant dense<0.000000e+00> : vector<18x80xf32>
    %51 = tpu.matmul %48, %50, %cst_28 {dimension_numbers = #tpu.dot_dimension_numbers<[1], [0], [0], [1], [0, 0, 1, 1], [], []>} : vector<18x70xf32>, vector<70x80xf32>, vector<18x80xf32> -> vector<18x80xf32>
    %52 = vector.extract_strided_slice %47 {offsets = [1, 0], sizes = [18, 70], strides = [1, 1]} : vector<20x70xf32> to vector<18x70xf32>
    %c1_29 = arith.constant 1 : index
    %c0_30 = arith.constant 0 : index
    %c0_31 = arith.constant 0 : index
    %53 = vector.load %arg3[%c1_29, %c0_30, %c0_31] : memref<3x70x80xf32, #tpu.memory_space<vmem>>, vector<1x70x80xf32>
    %54 = vector.shape_cast %53 : vector<1x70x80xf32> to vector<70x80xf32>
    %cst_32 = arith.constant dense<0.000000e+00> : vector<18x80xf32>
    %55 = tpu.matmul %52, %54, %cst_32 {dimension_numbers = #tpu.dot_dimension_numbers<[1], [0], [0], [1], [0, 0, 1, 1], [], []>} : vector<18x70xf32>, vector<70x80xf32>, vector<18x80xf32> -> vector<18x80xf32>
    %56 = arith.addf %51, %55 : vector<18x80xf32>
    %57 = vector.extract_strided_slice %47 {offsets = [2, 0], sizes = [18, 70], strides = [1, 1]} : vector<20x70xf32> to vector<18x70xf32>
    %c2_33 = arith.constant 2 : index
    %c0_34 = arith.constant 0 : index
    %c0_35 = arith.constant 0 : index
    %58 = vector.load %arg3[%c2_33, %c0_34, %c0_35] : memref<3x70x80xf32, #tpu.memory_space<vmem>>, vector<1x70x80xf32>
    %59 = vector.shape_cast %58 : vector<1x70x80xf32> to vector<70x80xf32>
    %cst_36 = arith.constant dense<0.000000e+00> : vector<18x80xf32>
    %60 = tpu.matmul %57, %59, %cst_36 {dimension_numbers = #tpu.dot_dimension_numbers<[1], [0], [0], [1], [0, 0, 1, 1], [], []>} : vector<18x70xf32>, vector<70x80xf32>, vector<18x80xf32> -> vector<18x80xf32>
    %61 = arith.addf %56, %60 : vector<18x80xf32>
    %c0_37 = arith.constant 0 : index
    %c0_38 = arith.constant 0 : index
    %62 = vector.load %arg8[%c0_37, %c0_38] : memref<1x80xf32, #tpu.memory_space<vmem>>, vector<1x80xf32>
    %63 = vector.broadcast %62 : vector<1x80xf32> to vector<18x80xf32>
    %64 = arith.addf %61, %63 : vector<18x80xf32>
    %c1_39 = arith.constant 1 : index
    %65 = memref.load %arg11[%c1_39] : memref<3xf32, #tpu.memory_space<smem>>
    %cst_40 = arith.constant 0.000000e+00 : f32
    %66 = vector.broadcast %cst_40 : f32 to vector<18x80xf32>
    %67 = arith.cmpf oge, %64, %66 : vector<18x80xf32>
    %68 = vector.broadcast %65 : f32 to vector<18x80xf32>
    %69 = arith.mulf %68, %64 : vector<18x80xf32>
    %70 = arith.select %67, %64, %69 : vector<18x80xi1>, vector<18x80xf32>
    %71 = vector.extract_strided_slice %70 {offsets = [0, 0], sizes = [16, 80], strides = [1, 1]} : vector<18x80xf32> to vector<16x80xf32>
    %c0_41 = arith.constant 0 : index
    %c0_42 = arith.constant 0 : index
    %c0_43 = arith.constant 0 : index
    %72 = vector.load %arg4[%c0_41, %c0_42, %c0_43] : memref<3x80x96xf32, #tpu.memory_space<vmem>>, vector<1x80x96xf32>
    %73 = vector.shape_cast %72 : vector<1x80x96xf32> to vector<80x96xf32>
    %cst_44 = arith.constant dense<0.000000e+00> : vector<16x96xf32>
    %74 = tpu.matmul %71, %73, %cst_44 {dimension_numbers = #tpu.dot_dimension_numbers<[1], [0], [0], [1], [0, 0, 1, 1], [], []>} : vector<16x80xf32>, vector<80x96xf32>, vector<16x96xf32> -> vector<16x96xf32>
    %75 = vector.extract_strided_slice %70 {offsets = [1, 0], sizes = [16, 80], strides = [1, 1]} : vector<18x80xf32> to vector<16x80xf32>
    %c1_45 = arith.constant 1 : index
    %c0_46 = arith.constant 0 : index
    %c0_47 = arith.constant 0 : index
    %76 = vector.load %arg4[%c1_45, %c0_46, %c0_47] : memref<3x80x96xf32, #tpu.memory_space<vmem>>, vector<1x80x96xf32>
    %77 = vector.shape_cast %76 : vector<1x80x96xf32> to vector<80x96xf32>
    %cst_48 = arith.constant dense<0.000000e+00> : vector<16x96xf32>
    %78 = tpu.matmul %75, %77, %cst_48 {dimension_numbers = #tpu.dot_dimension_numbers<[1], [0], [0], [1], [0, 0, 1, 1], [], []>} : vector<16x80xf32>, vector<80x96xf32>, vector<16x96xf32> -> vector<16x96xf32>
    %79 = arith.addf %74, %78 : vector<16x96xf32>
    %80 = vector.extract_strided_slice %70 {offsets = [2, 0], sizes = [16, 80], strides = [1, 1]} : vector<18x80xf32> to vector<16x80xf32>
    %c2_49 = arith.constant 2 : index
    %c0_50 = arith.constant 0 : index
    %c0_51 = arith.constant 0 : index
    %81 = vector.load %arg4[%c2_49, %c0_50, %c0_51] : memref<3x80x96xf32, #tpu.memory_space<vmem>>, vector<1x80x96xf32>
    %82 = vector.shape_cast %81 : vector<1x80x96xf32> to vector<80x96xf32>
    %cst_52 = arith.constant dense<0.000000e+00> : vector<16x96xf32>
    %83 = tpu.matmul %80, %82, %cst_52 {dimension_numbers = #tpu.dot_dimension_numbers<[1], [0], [0], [1], [0, 0, 1, 1], [], []>} : vector<16x80xf32>, vector<80x96xf32>, vector<16x96xf32> -> vector<16x96xf32>
    %84 = arith.addf %79, %83 : vector<16x96xf32>
    %c0_53 = arith.constant 0 : index
    %c0_54 = arith.constant 0 : index
    %85 = vector.load %arg9[%c0_53, %c0_54] : memref<1x96xf32, #tpu.memory_space<vmem>>, vector<1x96xf32>
    %86 = vector.broadcast %85 : vector<1x96xf32> to vector<16x96xf32>
    %87 = arith.addf %84, %86 : vector<16x96xf32>
    %c2_55 = arith.constant 2 : index
    %88 = memref.load %arg11[%c2_55] : memref<3xf32, #tpu.memory_space<smem>>
    %cst_56 = arith.constant 0.000000e+00 : f32
    %89 = vector.broadcast %cst_56 : f32 to vector<16x96xf32>
    %90 = arith.cmpf oge, %87, %89 : vector<16x96xf32>
    %91 = vector.broadcast %88 : f32 to vector<16x96xf32>
    %92 = arith.mulf %91, %87 : vector<16x96xf32>
    %93 = arith.select %90, %87, %92 : vector<16x96xi1>, vector<16x96xf32>
    %c0_57 = arith.constant 0 : index
    %c0_58 = arith.constant 0 : index
    %94 = vector.load %arg5[%c0_57, %c0_58] : memref<96x45xf32, #tpu.memory_space<vmem>>, vector<96x45xf32>
    %cst_59 = arith.constant dense<0.000000e+00> : vector<16x45xf32>
    %95 = tpu.matmul %93, %94, %cst_59 {dimension_numbers = #tpu.dot_dimension_numbers<[1], [0], [0], [1], [0, 0, 1, 1], [], []>} : vector<16x96xf32>, vector<96x45xf32>, vector<16x45xf32> -> vector<16x45xf32>
    %c0_60 = arith.constant 0 : index
    %c0_61 = arith.constant 0 : index
    %96 = vector.load %arg10[%c0_60, %c0_61] : memref<1x45xf32, #tpu.memory_space<vmem>>, vector<1x45xf32>
    %97 = vector.broadcast %96 : vector<1x45xf32> to vector<16x45xf32>
    %98 = arith.addf %95, %97 : vector<16x45xf32>
    %99 = tpu.iota {dimensions = array<i32: 1>} : vector<16x45xi32>
    %c0_i32 = arith.constant 0 : i32
    %100 = vector.broadcast %c0_i32 : i32 to vector<16x45xi32>
    %101 = arith.cmpi eq, %99, %100 : vector<16x45xi32>
    %c15_i32 = arith.constant 15 : i32
    %102 = vector.broadcast %c15_i32 : i32 to vector<16x45xi32>
    %103 = arith.cmpi eq, %99, %102 : vector<16x45xi32>
    %104 = arith.ori %101, %103 : vector<16x45xi1>
    %c30_i32 = arith.constant 30 : i32
    %105 = vector.broadcast %c30_i32 : i32 to vector<16x45xi32>
    %106 = arith.cmpi eq, %99, %105 : vector<16x45xi32>
    %107 = arith.ori %104, %106 : vector<16x45xi1>
    %cst_62 = arith.constant 0.000000e+00 : f32
    %108 = vector.broadcast %cst_62 : f32 to vector<16x45xf32>
    %109 = arith.subf %108, %98 : vector<16x45xf32>
    %110 = math.exp %109 : vector<16x45xf32>
    %cst_63 = arith.constant 1.000000e+00 : f32
    %111 = vector.broadcast %cst_63 : f32 to vector<16x45xf32>
    %112 = arith.addf %111, %110 : vector<16x45xf32>
    %cst_64 = arith.constant 1.000000e+00 : f32
    %113 = vector.broadcast %cst_64 : f32 to vector<16x45xf32>
    %114 = arith.divf %113, %112 : vector<16x45xf32>
    %115 = arith.select %107, %114, %98 : vector<16x45xi1>, vector<16x45xf32>
    %c0_65 = arith.constant 0 : index
    %c0_66 = arith.constant 0 : index
    %116 = vector.load %arg12[%c0_65, %c0_66] : memref<16x45xf32, #tpu.memory_space<vmem>>, vector<16x45xf32>
    tpu.vector_store %arg12[%c0_65, %c0_66], %115 {strides = array<i32>} : memref<16x45xf32, #tpu.memory_space<vmem>>, vector<16x45xf32>,
    return
  }
  func.func @transform_0(%arg0: i32) -> (i32, i32) {
    %c0_i32 = arith.constant 0 : i32
    %c0_i32_0 = arith.constant 0 : i32
    return %arg0, %c0_i32 : i32, i32
  }
  func.func @transform_1(%arg0: i32) -> (i32, i32, i32) {
    %c0_i32 = arith.constant 0 : i32
    %c0_i32_0 = arith.constant 0 : i32
    %c0_i32_1 = arith.constant 0 : i32
    %c0_i32_2 = arith.constant 0 : i32
    return %c0_i32, %c0_i32_0, %c0_i32_1 : i32, i32, i32
  }
  func.func @transform_2(%arg0: i32) -> (i32, i32, i32) {
    %c0_i32 = arith.constant 0 : i32
    %c0_i32_0 = arith.constant 0 : i32
    %c0_i32_1 = arith.constant 0 : i32
    %c0_i32_2 = arith.constant 0 : i32
    return %c0_i32, %c0_i32_0, %c0_i32_1 : i32, i32, i32
  }
  func.func @transform_3(%arg0: i32) -> (i32, i32, i32) {
    %c0_i32 = arith.constant 0 : i32
    %c0_i32_0 = arith.constant 0 : i32
    %c0_i32_1 = arith.constant 0 : i32
    %c0_i32_2 = arith.constant 0 : i32
    return %c0_i32, %c0_i32_0, %c0_i32_1 : i32, i32, i32
  }
  func.func @transform_4(%arg0: i32) -> (i32, i32) {
    %c0_i32 = arith.constant 0 : i32
    %c0_i32_0 = arith.constant 0 : i32
    %c0_i32_1 = arith.constant 0 : i32
    return %c0_i32, %c0_i32_0 : i32, i32
  }
  func.func @transform_5(%arg0: i32) -> (i32, i32, i32) {
    %c0_i32 = arith.constant 0 : i32
    %c0_i32_0 = arith.constant 0 : i32
    %c0_i32_1 = arith.constant 0 : i32
    %c0_i32_2 = arith.constant 0 : i32
    return %c0_i32, %c0_i32_0, %c0_i32_1 : i32, i32, i32
  }
  func.func @transform_6(%arg0: i32) -> (i32, i32) {
    %c0_i32 = arith.constant 0 : i32
    %c0_i32_0 = arith.constant 0 : i32
    %c0_i32_1 = arith.constant 0 : i32
    return %c0_i32, %c0_i32_0 : i32, i32
  }
  func.func @transform_7(%arg0: i32) -> (i32, i32) {
    %c0_i32 = arith.constant 0 : i32
    %c0_i32_0 = arith.constant 0 : i32
    %c0_i32_1 = arith.constant 0 : i32
    return %c0_i32, %c0_i32_0 : i32, i32
  }
  func.func @transform_8(%arg0: i32) -> (i32, i32) {
    %c0_i32 = arith.constant 0 : i32
    %c0_i32_0 = arith.constant 0 : i32
    %c0_i32_1 = arith.constant 0 : i32
    return %c0_i32, %c0_i32_0 : i32, i32
  }
  func.func @transform_9(%arg0: i32) -> (i32, i32) {
    %c0_i32 = arith.constant 0 : i32
    %c0_i32_0 = arith.constant 0 : i32
    %c0_i32_1 = arith.constant 0 : i32
    return %c0_i32, %c0_i32_0 : i32, i32
  }
  func.func @transform_10(%arg0: i32) -> i32 {
    %c0_i32 = arith.constant 0 : i32
    %c0_i32_0 = arith.constant 0 : i32
    return %c0_i32 : i32
  }
  func.func @transform_11(%arg0: i32) -> (i32, i32) {
    %c0_i32 = arith.constant 0 : i32
    %c0_i32_0 = arith.constant 0 : i32
    return %arg0, %c0_i32 : i32, i32
  }
}

</mosaic_0001>

<bundles_post_ra>
// kernel: pnet_forward_pallas.1
= control target key start
LH: loop header
LB: loop body
LE: loop exit
PB: predicated region body
PF: predicated region fallthrough
CT: control target
= control target key end

     0   :  { %16 = vsyncpa [#allocation3], 0  ;;  %s3063_s0 = inlined_call_operand.vmem [shape: f32[32,48], index: 0, kind: input, shape index: {}]   ;;  %s3064_s1 = inlined_call_operand.vmem [shape: f32[3,48,140], index: 1, kind: input, shape index: {}]   ;;  %s3065_s2 = inlined_call_operand.vmem [shape: f32[3,70,80], index: 2, kind: input, shape index: {}]   ;;  %s3066_s3 = inlined_call_operand.vmem [shape: f32[3,80,96], index: 3, kind: input, shape index: {}]   ;;  %s3067_s4 = inlined_call_operand.vmem [shape: f32[96,45], index: 4, kind: input, shape index: {}]   ;;  %s3068_s5 = inlined_call_operand.vmem [shape: f32[2,140,70], index: 5, kind: input, shape index: {}]   ;;  %s3069_s6 = inlined_call_operand.vmem [shape: f32[1,140], index: 6, kind: input, shape index: {}]   ;;  %s3070_s7 = inlined_call_operand.vmem [shape: f32[1,80], index: 7, kind: input, shape index: {}]   ;;  %s3071_s8 = inlined_call_operand.vmem [shape: f32[1,96], index: 8, kind: input, shape index: {}]   ;;  %s3072_s9 = inlined_call_operand.vmem [shape: f32[1,45], index: 9, kind: input, shape index: {}]   ;;  %s3073_s10 = inlined_call_operand.vmem [shape: f32[3], index: 10, kind: input, shape index: {}]   ;;  %s3074_s11 = inlined_call_operand.vmem [shape: f32[16,45], index: 11, kind: output, shape index: {}]  }
   0x1   :  { %s43_s19 = sshll.u32 %s3073_s10, 4  ;;  %s44_s19 = int_to_ptr.vmem [resolvable:$true] %s43_s19 }
   0x2   :  { %s2336_s20 = scalar_lea.vmem %s44_s19, 16  ;;  %p2341_p1 = scmp.lt.s32.totalorder %s44_s19, %s44_s19 }
   0x3   :  { %p2337_p0 = scmp.ne.s32.totalorder %s44_s19, %s2336_s20  ;;  %p2342_p2 = scmp.lt.s32.totalorder %s2336_s20, %s2336_s20 }
   0x5   :  { %p2343_p3 = por %p2342_p2, %p2341_p1 }
   0x7   :  { %p2344_p4 = pnand %p2343_p3, %p2337_p0 }
   0x9   :  { %2347 = shalt.err (!%p2344_p4)
}
   0xa   :  { %s2350_s21 = smov [#allocation2]  }
   0xb   :  { %46 = dma.vmem_to_smem %s44_s19, 16, %s2350_s21, [#allocation3]  }
   0xc   :  { %2348 = dma.done.wait [#allocation3], 16  }
   0xd   :  { %2349 = vsyncadd [#allocation3], 4294967280 }
   0xe   :  { %50 = sfence }
   0xf   :  { %v1668_v0 = vld [vmem:[%s3064_s1 + $0x68] sm:$0xff]  ;;  %v1670_v1 = vld [vmem:[%s3064_s1 + $0x78] sm:$0xff]  ;;  %v1667_v2 = vld [vmem:[%s3064_s1 + $0x60] sm:$0xff]  ;;  %v2351_v7 = vmov 0.0   ;;  %vm84_vm0 = vcmask 1046528   ;;  %vm92_vm1 = vcmask 392192  }
  0x10   :  { %v2071_v3 = vpack.c.bf16 %v1670_v1, %v1668_v0  ;;  %v1669_v4 = vld [vmem:[%s3064_s1 + $0x70] sm:$0xff]  ;;  %v1672_v5 = vld [vmem:[%s3064_s1 + $0x88] sm:$0xff]  ;;  %v1674_v6 = vld [vmem:[%s3064_s1 + $0x98] sm:$0xff]  ;;  %165 = vmatprep.mubr.f32.mxu0 %v2351_v7  ;;  %661 = vmatprep.mubr.f32.mxu1 %v2351_v7  ;;  %vm300_vm2 = vcmask 1045504   ;;  %s433_s21 = sld [smem:[#allocation2]]  ;;  %vm2352_vm11 = vmmov 1  }
  0x11   :  { %v2073_v8 = vpack.c.bf16 %v1669_v4, %v1667_v2  ;;  %v2075_v9 = vpack.c.bf16 %v1674_v6, %v1672_v5  ;;  %v1671_v10 = vld [vmem:[%s3064_s1 + $0x80] sm:$0xff]  ;;  %v1673_v11 = vld [vmem:[%s3064_s1 + $0x90] sm:$0xff]  ;;  %v1676_v12 = vld [vmem:[%s3064_s1 + $0xa8] sm:$0xff]  ;;  %vm489_vm15 = vcmask 244736   ;;  %s1804_s16 = sld [smem:[#allocation2 + $0x2]] }
  0x12   :  { %2072 = vmatprep.subr.bf16.mxu0 %v2071_v3  ;;  %v1678_v13 = vld [vmem:[%s3064_s1 + $0xb8] sm:$0xff]  ;;  %v2077_v14 = vpack.c.bf16 %v1673_v11, %v1671_v10  ;;  %v1675_v15 = vld [vmem:[%s3064_s1 + $0xa0] sm:$0xff]  ;;  %v1677_v17 = vld [vmem:[%s3064_s1 + $0xb0] sm:$0xff]  ;;  %v415_v10 = vlaneseq }
  0x13   :  { %2074 = vmatpush1.bf16.msra.mxu0 %v2073_v8  ;;  %v2079_v16 = vpack.c.bf16 %v1678_v13, %v1676_v12  ;;  %v2459_v18 = vld [vmem:[%s3063_s0] sm:$0xff]  ;;  %v2464_v19 = vld [vmem:[%s3063_s0 + $0x8] sm:$0xff]  ;;  %v58_v21 = vld [vmem:[%s3064_s1 + $0x18] sm:$0xff]  ;;  %v2081_v22 = vpack.c.bf16 %v1677_v17, %v1675_v15 }
  0x14   :  { %2076 = vmatprep.subr.bf16.mxu0 %v2075_v9  ;;  %v56_v20 = vld [vmem:[%s3064_s1 + $0x8] sm:$0xff]  ;;  %v85_v23 = vrot.slane %v2459_v18, 1  ;;  %v86_v24 = vrot.slane %v2464_v19, 1  ;;  %v2477_v25 = vld [vmem:[%s3063_s0 + $0x10] sm:$0xff]  ;;  %v55_v27 = vld [vmem:[%s3064_s1] sm:$0xff]  ;;  %v301_v2 = vrot.slane %v2459_v18, 2 }
  0x15   :  { %v2083_v26 = vpack.c.bf16 %v58_v21, %v56_v20  ;;  %v57_v28 = vld [vmem:[%s3064_s1 + $0x10] sm:$0xff]  ;;  %v60_v29 = vld [vmem:[%s3064_s1 + $0x28] sm:$0xff]  ;;  %v62_v30 = vld [vmem:[%s3064_s1 + $0x38] sm:$0xff]  ;;  %v88_v32 = vrot.slane %v2477_v25, 1  ;;  %v302_v3 = vrot.slane %v2464_v19, 2  ;;  %v304_v5 = vrot.slane %v2477_v25, 2 }
  0x16   :  { %v87_v31 = vsel %vm84_vm0, %v85_v23, %v86_v24  ;;  %v2085_v33 = vpack.c.bf16 %v57_v28, %v55_v27  ;;  %v2496_v34 = vld [vmem:[%s3063_s0 + $0x18] sm:$0xff]  ;;  %v2087_v35 = vpack.c.bf16 %v62_v30, %v60_v29  ;;  %v59_v36 = vld [vmem:[%s3064_s1 + $0x20] sm:$0xff]  ;;  %v61_v37 = vld [vmem:[%s3064_s1 + $0x30] sm:$0xff]  ;;  %v2590_v11 = vshrl.u32 %v415_v10, 7 }
  0x17   :  { %2078 = vmatpush1.bf16.msra.mxu0 %v2077_v14  ;;  %v64_v38 = vld [vmem:[%s3064_s1 + $0x48] sm:$0xff]  ;;  %v66_v39 = vld [vmem:[%s3064_s1 + $0x58] sm:$0xff]  ;;  %v89_v40 = vsel %vm84_vm0, %v86_v24, %v88_v32  ;;  %v90_v41 = vrot.slane %v2496_v34, 1  ;;  %v2089_v42 = vpack.c.bf16 %v61_v37, %v59_v36  ;;  %v63_v44 = vld [vmem:[%s3064_s1 + $0x40] sm:$0xff]  ;;  %v303_v4 = vsel %vm300_vm2, %v301_v2, %v302_v3 }
  0x18   :  { %2080 = vmatprep.subr.bf16.mxu0 %v2079_v16  ;;  %v2091_v43 = vpack.c.bf16 %v66_v39, %v64_v38  ;;  %v65_v45 = vld [vmem:[%s3064_s1 + $0x50] sm:$0xff]  ;;  %v1688_v46 = vld [vmem:[%s3064_s1 + $0xc8] sm:$0xff]  ;;  %v1690_v47 = vld [vmem:[%s3064_s1 + $0xd8] sm:$0xff]  ;;  %v305_v6 = vsel %vm300_vm2, %v302_v3, %v304_v5  ;;  %v306_v8 = vrot.slane %v2496_v34, 2  ;;  %v417_v12 = vsub.s32 0, %v2590_v11 }
  0x19   :  { %v91_v48 = vsel %vm84_vm0, %v88_v32, %v90_v41  ;;  %v2093_v49 = vpack.c.bf16 %v65_v45, %v63_v44  ;;  %v2095_v50 = vpack.c.bf16 %v1690_v47, %v1688_v46  ;;  %v1687_v51 = vld [vmem:[%s3064_s1 + $0xc0] sm:$0xff]  ;;  %v1689_v52 = vld [vmem:[%s3064_s1 + $0xd0] sm:$0xff]  ;;  %v1692_v53 = vld [vmem:[%s3064_s1 + $0xe8] sm:$0xff]  ;;  %v421_v14 = vsub.s32 1, %v2590_v11 }
  0x1a   :  { %v1694_v54 = vld [vmem:[%s3064_s1 + $0xf8] sm:$0xff]  ;;  %v2097_v55 = vpack.c.bf16 %v1689_v52, %v1687_v51  ;;  %v1691_v57 = vld [vmem:[%s3064_s1 + $0xe0] sm:$0xff]  ;;  %v1693_v58 = vld [vmem:[%s3064_s1 + $0xf0] sm:$0xff]  ;;  %v307_v9 = vsel %vm300_vm2, %v304_v5, %v306_v8  ;;  %v442_v20 = vstv %s433_s21  ;;  %v461_v36 = vadd.s32 8, %v2590_v11  ;;  %s1776_s21 = sld [smem:[#allocation2 + $0x1]] }
  0x1b   :  { %2082 = vmatpush1.bf16.msra.mxu0 %v2081_v22  ;;  %v2099_v56 = vpack.c.bf16 %v1694_v54, %v1692_v53  ;;  %v1696_v59 = vld [vmem:[%s3064_s1 + $0x108] sm:$0xff]  ;;  %v1698_v60 = vld [vmem:[%s3064_s1 + $0x118] sm:$0xff]  ;;  %v2101_v61 = vpack.c.bf16 %v1693_v58, %v1691_v57  ;;  %v1695_v63 = vld [vmem:[%s3064_s1 + $0x100] sm:$0xff]  ;;  %v462_v52 = vadd.s32 16, %v2590_v11 }
  0x1c   :  { %2084 = vmatprep.subr.bf16.mxu0 %v2083_v26  ;;  %v2103_v62 = vpack.c.bf16 %v1698_v60, %v1696_v59  ;;  %v1697_v0 = vld [vmem:[%s3064_s1 + $0x110] sm:$0xff]  ;;  %v413_v13 = vld [vmem:[%s3069_s6] sm:$0x3]  ;;  %vm2112_vm12 = vmpackc.low %vm300_vm2, %vm2352_vm11 }
  0x1d   :  { %v2105_v1 = vpack.c.bf16 %v1697_v0, %v1695_v63  ;;  %v418_v15 = vrot.slane %v413_v13, %v417_v12  ;;  %v422_v16 = vrot.slane %v413_v13, %v421_v14  ;;  %v687_v63 = vld [vmem:[%s3068_s5 + $0x8] sm:$0xff]  ;;  %v1723_v0 = vld [vmem:[%s3068_s5 + $0x90] sm:$0xff]  ;;  %v1725_v12 = vld [vmem:[%s3068_s5 + $0xa0] sm:$0xff] }
  0x1e   :  { %1679 = vmatmul.mubr.msk.f32.vlgmr.msra.gmra.mrb[0].mxu0 %vm92_vm1, %v87_v31  ;;  %v465_v31 = vmul.u32 2, %v2590_v11  ;;  %v689_v11 = vld [vmem:[%s3068_s5 + $0x18] sm:$0xff]  ;;  %v1726_v13 = vld [vmem:[%s3068_s5 + $0xa8] sm:$0xff] }
  0x1f   :  { %171 = vmatprep.mubr.f32.mxu0 %v2351_v7  ;;  %2086 = vmatpush1.bf16.msra.mxu0 %v2085_v33 }
  0x20   :  { %2088 = vmatprep.subr.bf16.mxu0 %v2087_v35  ;;  %v477_v47 = vadd.s32 1, %v465_v31 }
  0x22   :  { %1680 = vmatmul.mubr.msk.f32.gmra.mrb[2].mxu0 %vm92_vm1, %v89_v40 }
  0x23   :  { %177 = vmatprep.mubr.f32.mxu0 %v2351_v7  ;;  %2090 = vmatpush1.bf16.msra.mxu0 %v2089_v42  ;;  %v2599_v42 = vand.u32 127, %v415_v10  ;;  %v688_v10 = vld [vmem:[%s3068_s5 + $0x10] sm:$0xff] }
  0x24   :  { %2092 = vmatprep.subr.bf16.mxu0 %v2091_v43 }
  0x25   :  { %vm468_vm13 = vcmp.eq.s32.totalorder %v2599_v42, %v465_v31  ;;  %vm480_vm14 = vcmp.eq.s32.totalorder %v2599_v42, %v477_v47  ;;  %v699_v47 = vld [vmem:[%s3068_s5 + $0x68] sm:$0xff] }
  0x26   :  { %1681 = vmatmul.mubr.msk.f32.gmra.mrb[4].mxu0 %vm92_vm1, %v91_v48  ;;  %v1703_v2 = vsel %vm468_vm13, 1.0, %v2351_v7  ;;  %v1706_v3 = vsel %vm480_vm14, 1.0, %v2351_v7  ;;  %vm1266_vm13 = vcmask 654336  }
  0x27   :  { %183 = vmatprep.mubr.f32.mxu0 %v2351_v7  ;;  %2094 = vmatpush1.bf16.msra.mxu0 %v2093_v49 }
  0x28   :  { %2096 = vmatprep.subr.bf16.mxu0 %v2095_v50  ;;  %v466_v50 = vmul.u32 2, %v461_v36  ;;  %v1732_v36 = vld [vmem:[%s3068_s5 + $0xd8] sm:$0xff] }
  0x2a   :  { %1682 = vmatmul.mubr.msk.f32.gmra.mrb[6].mxu0 %vm92_vm1, %v90_v41  ;;  %v478_v60 = vadd.s32 1, %v466_v50 }
  0x2b   :  { %262 = vmatprep.mubr.f32.mxu0 %v2351_v7 }
  0x2e   :  { %1683 = vmatmul.mubr.msk.f32.vlgmr.msra.gmra.mrb[0].mxu0 %vm92_vm1, %v2459_v18 }
  0x2f   :  { %268 = vmatprep.mubr.f32.mxu0 %v2351_v7  ;;  %2098 = vmatpush1.bf16.msra.mxu0 %v2097_v55 }
  0x30   :  { %2100 = vmatprep.subr.bf16.mxu0 %v2099_v56 }
  0x32   :  { %1684 = vmatmul.mubr.msk.f32.gmra.mrb[2].mxu0 %vm92_vm1, %v2464_v19 }
  0x33   :  { %274 = vmatprep.mubr.f32.mxu0 %v2351_v7  ;;  %2102 = vmatpush1.bf16.msra.mxu0 %v2101_v61  ;;  %v467_v61 = vmul.u32 2, %v462_v52  ;;  %v700_v52 = vld [vmem:[%s3068_s5 + $0x70] sm:$0xff] }
  0x34   :  { %2104 = vmatprep.subr.bf16.mxu0 %v2103_v62  ;;  %v686_v62 = vld [vmem:[%s3068_s5] sm:$0xff] }
  0x35   :  { %v479_v5 = vadd.s32 1, %v467_v61 }
  0x36   :  { %1685 = vmatmul.mubr.msk.f32.gmra.mrb[4].mxu0 %vm92_vm1, %v2477_v25 }
  0x37   :  { %280 = vmatprep.mubr.f32.mxu0 %v2351_v7  ;;  %2106 = vmatpush1.bf16.msra.mxu0 %v2105_v1  ;;  %v1724_v1 = vld [vmem:[%s3068_s5 + $0x98] sm:$0xff] }
  0x3a   :  { %1686 = vmatmul.mubr.msk.f32.gmra.mrb[6].mxu0 %vm92_vm1, %v2496_v34 }
  0x3b   :  { %380 = vmatprep.mubr.f32.mxu0 %v2351_v7 }
  0x3e   :  { %1699 = vmatmul.mubr.msk.f32.vlgmr.msra.gmra.mrb[0].mxu0 %vm92_vm1, %v303_v4 }
  0x3f   :  { %386 = vmatprep.mubr.f32.mxu0 %v2351_v7 }
  0x42   :  { %1700 = vmatmul.mubr.msk.f32.gmra.mrb[2].mxu0 %vm92_vm1, %v305_v6  ;;  %v2353_v6 = vmov 0.0|0.0  }
  0x43   :  { %392 = vmatprep.mubr.f32.mxu0 %v2351_v7 }
  0x46   :  { %1701 = vmatmul.mubr.msk.f32.gmra.mrb[4].mxu0 %vm92_vm1, %v307_v9  ;;  %v2156_v9 = vpack.c.bf16 %v1724_v1, %v1723_v0  ;;  %v1745_v0 = vld [vmem:[%s3065_s2 + $0x48] sm:$0xff]  ;;  %v1746_v1 = vld [vmem:[%s3065_s2 + $0x50] sm:$0xff] }
  0x47   :  { %398 = vmatprep.mubr.f32.mxu0 %v2351_v7 }
  0x4a   :  { %1702 = vmatmul.mubr.msk.f32.gmra.mrb[6].mxu0 %vm92_vm1, %v306_v8  ;;  %vm2621_vm1 = vcmp.eq.s32.totalorder %v2599_v42, %v466_v50  ;;  %v2128_v8 = vpack.c.bf16 %v687_v63, %v686_v62  ;;  %v1740_v62 = vld [vmem:[%s3068_s5 + $0x118] sm:$0xf] }
  0x4b   :  { %569 = vmatprep.mubr.f32.mxu0 %v2351_v7  ;;  %v1704_v14 = vsel %vm2621_vm1, 1.0, %v2351_v7  ;;  %vm1640_vm1 = vcmp.eq.s32.totalorder %v2599_v42, 0 }
 0x111   :  { %v382_v17 = vpop.f32.mrb[0].mxu0 }
 0x112   :  { %v425_v18 = vadd.f32 %v418_v15, %v382_v17  ;;  %v384_v19 = vpop.f32.mrb[1].mxu0  ;;  %v2131_v17 = vpack.c.bf16 %v689_v11, %v688_v10 }
 0x113   :  { %v426_v21 = vadd.f32 %v422_v16, %v384_v19  ;;  %v690_v19 = vld [vmem:[%s3068_s5 + $0x20] sm:$0xff] }
 0x114   :  { %v443_v23 = vmul.f32 %v442_v20, %v425_v18  ;;  %vm434_vm3 = vcmp.ge.f32.partialorder %v425_v18, 0.0 }
 0x115   :  { %v388_v22 = vpop.f32.mrb[2].mxu0  ;;  %v444_v26 = vmul.f32 %v442_v20, %v426_v21  ;;  %vm435_vm4 = vcmp.ge.f32.partialorder %v426_v21, 0.0 }
 0x116   :  { %v427_v24 = vadd.f32 %v418_v15, %v388_v22  ;;  %v390_v25 = vpop.f32.mrb[3].mxu0  ;;  %v451_v32 = vsel %vm434_vm3, %v425_v18, %v443_v23  ;;  %vm481_vm3 = vcmp.eq.s32.totalorder %v2599_v42, %v478_v60  ;;  %v2159_v18 = vpack.c.bf16 %v1726_v13, %v1725_v12  ;;  %v1728_v22 = vld [vmem:[%s3068_s5 + $0xb8] sm:$0xff]  ;;  %v1739_v60 = vld [vmem:[%s3068_s5 + $0x110] sm:$0xff] }
 0x117   :  { %v428_v27 = vadd.f32 %v422_v16, %v390_v25  ;;  %v452_v39 = vsel %vm435_vm4, %v426_v21, %v444_v26  ;;  %vm2651_vm4 = vcmp.eq.s32.totalorder %v2599_v42, %v467_v61  ;;  %v1727_v21 = vld [vmem:[%s3068_s5 + $0xb0] sm:$0xff]  ;;  %v2180_v63 = vpack.c.bf16 %v1740_v62, %v1739_v60 }
 0x118   :  { %vm436_vm5 = vcmp.ge.f32.partialorder %v427_v24, 0.0  ;;  %v445_v28 = vmul.f32 %v442_v20, %v427_v24  ;;  %v1705_v23 = vsel %vm2651_vm4, 1.0, %v2351_v7  ;;  %v2162_v26 = vpack.c.bf16 %v1728_v22, %v1727_v21 }
 0x119   :  { %vm437_vm6 = vcmp.ge.f32.partialorder %v428_v27, 0.0  ;;  %v446_v29 = vmul.f32 %v442_v20, %v428_v27  ;;  %v394_v30 = vpop.f32.mrb[4].mxu0  ;;  %v2184_v12 = vpack.c.bf16 %v1746_v1, %v1745_v0 }
 0x11a   :  { %v453_v33 = vsel %vm436_vm5, %v427_v24, %v445_v28  ;;  %v429_v34 = vadd.f32 %v418_v15, %v394_v30  ;;  %v396_v35 = vpop.f32.mrb[5].mxu0  ;;  %vm482_vm5 = vcmp.eq.s32.totalorder %v2599_v42, %v479_v5  ;;  %v693_v28 = vld [vmem:[%s3068_s5 + $0x38] sm:$0xff]  ;;  %v1730_v30 = vld [vmem:[%s3068_s5 + $0xc8] sm:$0xff] }
 0x11b   :  { %v2109_v37 = vpack.c.bf16 %v453_v33, %v451_v32  ;;  %v430_v38 = vadd.f32 %v422_v16, %v396_v35  ;;  %v454_v40 = vsel %vm437_vm6, %v428_v27, %v446_v29  ;;  %v1708_v24 = vsel %vm482_vm5, 1.0, %v2351_v7  ;;  %v692_v27 = vld [vmem:[%s3068_s5 + $0x30] sm:$0xff]  ;;  %v1729_v29 = vld [vmem:[%s3068_s5 + $0xc0] sm:$0xff] }
 0x11c   :  { %v2107_v41 = vpack.c.bf16 %v454_v40, %v452_v39  ;;  %v447_v44 = vmul.f32 %v442_v20, %v429_v34  ;;  %vm438_vm7 = vcmp.ge.f32.partialorder %v429_v34, 0.0  ;;  %v2137_v31 = vpack.c.bf16 %v693_v28, %v692_v27  ;;  %v694_v33 = vld [vmem:[%s3068_s5 + $0x40] sm:$0xff]  ;;  %v1731_v35 = vld [vmem:[%s3068_s5 + $0xd0] sm:$0xff]  ;;  %v697_v40 = vld [vmem:[%s3068_s5 + $0x58] sm:$0xff] }
 0x11d   :  { %v400_v43 = vpop.f32.mrb[6].mxu0  ;;  %v448_v48 = vmul.f32 %v442_v20, %v430_v38  ;;  %vm439_vm8 = vcmp.ge.f32.partialorder %v430_v38, 0.0  ;;  %v2165_v32 = vpack.c.bf16 %v1730_v30, %v1729_v29  ;;  %v696_v39 = vld [vmem:[%s3068_s5 + $0x50] sm:$0xff]  ;;  %vm714_vm6 = vcmask 1043456  }
 0x11e   :  { %v431_v45 = vadd.f32 %v418_v15, %v400_v43  ;;  %v402_v46 = vpop.f32.mrb[7].mxu0  ;;  %2108 = vmatprep.subr.bf16.mxu0 %v2107_v41  ;;  %2118 = vmatprep.subr.bf16.mxu1 %v2107_v41  ;;  %v455_v54 = vsel %vm438_vm7, %v429_v34, %v447_v44  ;;  %v1707_v15 = vsel %vm481_vm3, 1.0, %v2351_v7  ;;  %v695_v34 = vld [vmem:[%s3068_s5 + $0x48] sm:$0xff]  ;;  %v1733_v41 = vld [vmem:[%s3068_s5 + $0xe0] sm:$0xff]  ;;  %v2143_v44 = vpack.c.bf16 %v697_v40, %v696_v39  ;;  %vm2153_vm7 = vmpackc.low %vm714_vm6, %vm2352_vm11 }
 0x11f   :  { %v432_v49 = vadd.f32 %v422_v16, %v402_v46  ;;  %2110 = vmatpush1.bf16.msra.mxu0 %v2109_v37  ;;  %2120 = vmatpush1.bf16.msra.mxu1 %v2109_v37  ;;  %v456_v56 = vsel %vm439_vm8, %v430_v38, %v448_v48  ;;  %v2140_v37 = vpack.c.bf16 %v695_v34, %v694_v33  ;;  %v1734_v43 = vld [vmem:[%s3068_s5 + $0xe8] sm:$0xff]  ;;  %v698_v46 = vld [vmem:[%s3068_s5 + $0x60] sm:$0xff]  ;;  %v1735_v48 = vld [vmem:[%s3068_s5 + $0xf0] sm:$0xff]  ;;  %vm704_vm8 = vcmask 97280  }
 0x120   :  { %vm440_vm9 = vcmp.ge.f32.partialorder %v431_v45, 0.0  ;;  %v449_v51 = vmul.f32 %v442_v20, %v431_v45  ;;  %v2168_v38 = vpack.c.bf16 %v1732_v36, %v1731_v35  ;;  %v2146_v50 = vpack.c.bf16 %v699_v47, %v698_v46  ;;  %v1764_v16 = vld [vmem:[%s3065_s2 + $0xa0] sm:$0xff]  ;;  %v1750_v27 = vld [vmem:[%s3065_s2 + $0x70] sm:$0xff]  ;;  %v1767_v36 = vld [vmem:[%s3065_s2 + $0xb8] sm:$0xff] }
 0x121   :  { %vm441_vm10 = vcmp.ge.f32.partialorder %v432_v49, 0.0  ;;  %v450_v53 = vmul.f32 %v442_v20, %v432_v49  ;;  %v691_v20 = vld [vmem:[%s3068_s5 + $0x28] sm:$0xff]  ;;  %v1766_v35 = vld [vmem:[%s3065_s2 + $0xb0] sm:$0xff]  ;;  %v1752_v39 = vld [vmem:[%s3065_s2 + $0x80] sm:$0xff]  ;;  %vm1641_vm3 = vcmp.eq.s32.totalorder %v2599_v42, 15  ;;  %vm1643_vm5 = vcmp.eq.s32.totalorder %v2599_v42, 30 }
 0x122   :  { %v457_v55 = vsel %vm440_vm9, %v431_v45, %v449_v51  ;;  %v2134_v25 = vpack.c.bf16 %v691_v20, %v690_v19  ;;  %v2171_v45 = vpack.c.bf16 %v1734_v43, %v1733_v41  ;;  %v1768_v41 = vld [vmem:[%s3065_s2 + $0xc0] sm:$0xff]  ;;  %v1769_v43 = vld [vmem:[%s3065_s2 + $0xc8] sm:$0xff]  ;;  %v1770_v46 = vld [vmem:[%s3065_s2 + $0xd0] sm:$0x3f]  ;;  %vm2354_vm9 = vmmov 0  }
 0x123   :  { %v2114_v57 = vpack.c.bf16 %v457_v55, %v455_v54  ;;  %v458_v58 = vsel %vm441_vm10, %v432_v49, %v450_v53  ;;  %v1736_v49 = vld [vmem:[%s3068_s5 + $0xf8] sm:$0xff]  ;;  %v1737_v54 = vld [vmem:[%s3068_s5 + $0x100] sm:$0xff]  ;;  %v1738_v55 = vld [vmem:[%s3068_s5 + $0x108] sm:$0xff]  ;;  %vm930_vm10 = vcmask 572416  }
 0x124   :  { %v2111_v59 = vpack.c.bf16 %v458_v58, %v456_v56  ;;  %v2174_v51 = vpack.c.bf16 %v1736_v49, %v1735_v48  ;;  %v701_v53 = vld [vmem:[%s3068_s5 + $0x78] sm:$0xff]  ;;  %v702_v58 = vld [vmem:[%s3068_s5 + $0x80] sm:$0xff]  ;;  %vm1642_vm4 = vmor %vm1640_vm1, %vm1641_vm3 }
 0x125   :  { %v2149_v56 = vpack.c.bf16 %v701_v53, %v700_v52  ;;  %v903_v52 = vld [vmem:[%s3065_s2] sm:$0xff]  ;;  %v904_v53 = vld [vmem:[%s3065_s2 + $0x8] sm:$0xff]  ;;  %vm1644_vm6 = vmor %vm1642_vm4, %vm1643_vm5 }
 0x126   :  { %2113 = vmatprep.subr.msk.bf16.mxu0 %vm2112_vm12, %v2111_v59  ;;  %2123 = vmatprep.subr.msk.bf16.mxu1 %vm2112_vm12, %v2111_v59  ;;  %v703_v59 = vld [vmem:[%s3068_s5 + $0x88] sm:$0xf] }
 0x127   :  { %2116 = vmatpush1.bf16.msk.msra.mxu0 %vm2112_vm12, %v2114_v57  ;;  %2126 = vmatpush1.bf16.msk.msra.mxu1 %vm2112_vm12, %v2114_v57  ;;  %v2177_v57 = vpack.c.bf16 %v1738_v55, %v1737_v54  ;;  %v2152_v61 = vpack.c.bf16 %v703_v59, %v702_v58  ;;  %v2196_v59 = vpack.c.bf16 %v904_v53, %v903_v52 }
 0x128   :  { %2127 = vmatprep.subr.bf16.mxu1 %v2353_v6  ;;  %2155 = vmatprep.subr.bf16.mxu0 %v2353_v6 }
 0x12a   :  { %1711 = vmatmul.mubr.msk.f32.vlgmr.msra.gmra.mrb[8].mxu0 %vm489_vm15, %v1703_v2  ;;  %1716 = vmatmul.mubr.msk.f32.vlgmr.msra.gmra.mrb[0].mxu1 %vm489_vm15, %v1706_v3  ;;  %v1762_v2 = vld [vmem:[%s3065_s2 + $0x90] sm:$0xff]  ;;  %v1763_v3 = vld [vmem:[%s3065_s2 + $0x98] sm:$0xff] }
 0x12b   :  { %575 = vmatprep.mubr.f32.mxu0 %v2351_v7  ;;  %667 = vmatprep.mubr.f32.mxu1 %v2351_v7  ;;  %v2208_v13 = vpack.c.bf16 %v1763_v3, %v1762_v2  ;;  %v905_v2 = vld [vmem:[%s3065_s2 + $0x10] sm:$0xff]  ;;  %v906_v3 = vld [vmem:[%s3065_s2 + $0x18] sm:$0xff] }
 0x12c   :  { %2129 = vmatpush1.bf16.msra.mxu1 %v2128_v8  ;;  %2157 = vmatpush1.bf16.msra.mxu0 %v2156_v9 }
 0x12d   :  { %2130 = vmatprep.subr.bf16.mxu1 %v2353_v6  ;;  %2158 = vmatprep.subr.bf16.mxu0 %v2353_v6 }
 0x12e   :  { %1712 = vmatmul.mubr.msk.f32.gmra.mrb[10].mxu0 %vm489_vm15, %v1704_v14  ;;  %1717 = vmatmul.mubr.msk.f32.gmra.mrb[2].mxu1 %vm489_vm15, %v1707_v15  ;;  %v1747_v14 = vld [vmem:[%s3065_s2 + $0x58] sm:$0xff]  ;;  %v1748_v15 = vld [vmem:[%s3065_s2 + $0x60] sm:$0xff] }
 0x12f   :  { %581 = vmatprep.mubr.f32.mxu0 %v2351_v7  ;;  %673 = vmatprep.mubr.f32.mxu1 %v2351_v7 }
 0x130   :  { %2132 = vmatpush1.bf16.msra.mxu1 %v2131_v17  ;;  %2160 = vmatpush1.bf16.msra.mxu0 %v2159_v18  ;;  %v1765_v17 = vld [vmem:[%s3065_s2 + $0xa8] sm:$0xff] }
 0x131   :  { %2133 = vmatprep.subr.bf16.mxu1 %v2353_v6  ;;  %2161 = vmatprep.subr.bf16.mxu0 %v2353_v6 }
 0x132   :  { %1713 = vmatmul.mubr.msk.f32.gmra.mrb[12].mxu0 %vm489_vm15, %v1705_v23  ;;  %1718 = vmatmul.mubr.msk.f32.gmra.mrb[4].mxu1 %vm489_vm15, %v1708_v24  ;;  %v2187_v24 = vpack.c.bf16 %v1748_v15, %v1747_v14  ;;  %v907_v14 = vld [vmem:[%s3065_s2 + $0x20] sm:$0xff]  ;;  %v908_v15 = vld [vmem:[%s3065_s2 + $0x28] sm:$0xff]  ;;  %vm1558_vm15 = vcmask 785408  }
 0x134   :  { %2135 = vmatpush1.bf16.msra.mxu1 %v2134_v25  ;;  %2163 = vmatpush1.bf16.msra.mxu0 %v2162_v26  ;;  %v2211_v25 = vpack.c.bf16 %v1765_v17, %v1764_v16  ;;  %v1749_v26 = vld [vmem:[%s3065_s2 + $0x68] sm:$0xff] }
 0x135   :  { %2136 = vmatprep.subr.bf16.mxu1 %v2353_v6  ;;  %2164 = vmatprep.subr.bf16.mxu0 %v2353_v6  ;;  %v2190_v34 = vpack.c.bf16 %v1750_v27, %v1749_v26  ;;  %v1781_v27 = vld [vmem:[%s3066_s3 + $0x70] sm:$0xff] }
 0x138   :  { %2138 = vmatpush1.bf16.msra.mxu1 %v2137_v31  ;;  %2166 = vmatpush1.bf16.msra.mxu0 %v2165_v32 }
 0x139   :  { %2139 = vmatprep.subr.bf16.mxu1 %v2353_v6  ;;  %2167 = vmatprep.subr.bf16.mxu0 %v2353_v6 }
 0x13c   :  { %2141 = vmatpush1.bf16.msra.mxu1 %v2140_v37  ;;  %2169 = vmatpush1.bf16.msra.mxu0 %v2168_v38  ;;  %v2214_v37 = vpack.c.bf16 %v1767_v36, %v1766_v35  ;;  %v1751_v38 = vld [vmem:[%s3065_s2 + $0x78] sm:$0xff]  ;;  %v1237_v36 = vld [vmem:[%s3066_s3] sm:$0xff] }
 0x13d   :  { %2142 = vmatprep.subr.bf16.mxu1 %v2353_v6  ;;  %2170 = vmatprep.subr.bf16.mxu0 %v2353_v6  ;;  %v2193_v40 = vpack.c.bf16 %v1752_v39, %v1751_v38  ;;  %v1539_v39 = vld [vmem:[%s3067_s4] sm:$0xff] }
 0x140   :  { %2144 = vmatpush1.bf16.msra.mxu1 %v2143_v44  ;;  %2172 = vmatpush1.bf16.msra.mxu0 %v2171_v45  ;;  %v2217_v44 = vpack.c.bf16 %v1769_v43, %v1768_v41  ;;  %v1753_v45 = vld [vmem:[%s3065_s2 + $0x88] sm:$0x3f]  ;;  %v1541_v41 = vld [vmem:[%s3067_s4 + $0x10] sm:$0xff] }
 0x141   :  { %2145 = vmatprep.subr.bf16.mxu1 %v2353_v6  ;;  %2173 = vmatprep.subr.bf16.mxu0 %v2353_v6 }
 0x144   :  { %2147 = vmatpush1.bf16.msra.mxu1 %v2146_v50  ;;  %2175 = vmatpush1.bf16.msra.mxu0 %v2174_v51 }
 0x145   :  { %2148 = vmatprep.subr.bf16.mxu1 %v2353_v6  ;;  %2176 = vmatprep.subr.bf16.mxu0 %v2353_v6 }
 0x148   :  { %2150 = vmatpush1.bf16.msra.mxu1 %v2149_v56  ;;  %2178 = vmatpush1.bf16.msra.mxu0 %v2177_v57 }
 0x149   :  { %2151 = vmatprep.subr.bf16.mxu1 %v2353_v6  ;;  %2179 = vmatprep.subr.bf16.mxu0 %v2353_v6 }
 0x14c   :  { %2154 = vmatpush1.bf16.msk.msra.mxu1 %vm2153_vm7, %v2152_v61  ;;  %2182 = vmatpush1.bf16.msk.msra.mxu0 %vm2153_vm7, %v2180_v63  ;;  %vm1659_vm7 = vcmask 367616  }
 0x14d   :  { %2183 = vmatprep.subr.bf16.mxu1 %v2353_v6  ;;  %2207 = vmatprep.subr.bf16.mxu0 %v2353_v6 }
 0x1fd   :  { %v571_v4 = vpop.f32.mrb[8].mxu0  ;;  %v663_v5 = vpop.f32.mrb[0].mxu1 }
 0x1fe   :  { %v680_v8 = vmax.f32 %v571_v4, %v663_v5  ;;  %v573_v9 = vpop.f32.mrb[9].mxu0  ;;  %v665_v10 = vpop.f32.mrb[1].mxu1 }
 0x1ff   :  { %v681_v11 = vmax.f32 %v573_v9, %v665_v10 }
 0x201   :  { %v577_v18 = vpop.f32.mrb[10].mxu0  ;;  %v669_v19 = vpop.f32.mrb[2].mxu1  ;;  %1720 = vmatprep.mubr.msk.f32.mxu1 %vm704_vm8, %v681_v11  ;;  %1742 = vmatprep.mubr.msk.f32.mxu0 %vm704_vm8, %v681_v11 }
 0x202   :  { %v682_v20 = vmax.f32 %v577_v18, %v669_v19  ;;  %v579_v21 = vpop.f32.mrb[11].mxu0  ;;  %v671_v22 = vpop.f32.mrb[3].mxu1  ;;  %783 = vmatmul.mubr.f32.vlgmr.msra.gmra.mrb[6].mxu1 %v680_v8  ;;  %885 = vmatmul.mubr.f32.vlgmr.msra.gmra.mrb[14].mxu0 %v680_v8  ;;  %v2202_v18 = vpack.c.bf16 %v908_v15, %v907_v14  ;;  %v909_v19 = vld [vmem:[%s3065_s2 + $0x30] sm:$0xff] }
 0x203   :  { %v683_v23 = vmax.f32 %v579_v21, %v671_v22  ;;  %2185 = vmatpush3.bf16.msra.mxu1 %v2184_v12  ;;  %2209 = vmatpush3.bf16.msra.mxu0 %v2208_v13  ;;  %v2199_v13 = vpack.c.bf16 %v906_v3, %v905_v2  ;;  %v911_v22 = vld [vmem:[%s3065_s2 + $0x40] sm:$0x3f] }
 0x204   :  { %2186 = vmatprep.subr.bf16.mxu1 %v2353_v6  ;;  %2210 = vmatprep.subr.bf16.mxu0 %v2353_v6  ;;  %v1775_v3 = vld [vmem:[%s3070_s7] ss:$0 sm:$0xff] }
 0x205   :  { %v583_v28 = vpop.f32.mrb[12].mxu0  ;;  %v675_v29 = vpop.f32.mrb[4].mxu1  ;;  %1721 = vmatprep.mubr.msk.f32.mxu1 %vm704_vm8, %v683_v23  ;;  %1743 = vmatprep.mubr.msk.f32.mxu0 %vm704_vm8, %v683_v23  ;;  %v1778_v23 = vld [vmem:[%s3066_s3 + $0x58] sm:$0xff] }
 0x206   :  { %v684_v30 = vmax.f32 %v583_v28, %v675_v29  ;;  %v585_v31 = vpop.f32.mrb[13].mxu0  ;;  %v677_v32 = vpop.f32.mrb[5].mxu1  ;;  %788 = vmatmul.mubr.f32.gmra.mrb[8].mxu1 %v682_v20  ;;  %890 = vmatmul.mubr.f32.gmra.mrb[16].mxu0 %v682_v20  ;;  %v910_v20 = vld [vmem:[%s3065_s2 + $0x38] sm:$0xff] }
 0x207   :  { %v685_v33 = vmax.f32 %v585_v31, %v677_v32  ;;  %2188 = vmatpush3.bf16.msra.mxu1 %v2187_v24  ;;  %2212 = vmatpush3.bf16.msra.mxu0 %v2211_v25  ;;  %v2205_v21 = vpack.c.bf16 %v910_v20, %v909_v19  ;;  %v1779_v25 = vld [vmem:[%s3066_s3 + $0x60] sm:$0xff]  ;;  %v1782_v28 = vld [vmem:[%s3066_s3 + $0x78] sm:$0xff]  ;;  %v1784_v31 = vld [vmem:[%s3066_s3 + $0x88] sm:$0xff] }
 0x208   :  { %2189 = vmatprep.subr.bf16.mxu1 %v2353_v6  ;;  %2213 = vmatprep.subr.bf16.mxu0 %v2353_v6  ;;  %v2227_v29 = vpack.c.bf16 %v1782_v28, %v1781_v27  ;;  %v1239_v27 = vld [vmem:[%s3066_s3 + $0x10] sm:$0xff]  ;;  %v1240_v28 = vld [vmem:[%s3066_s3 + $0x18] sm:$0xff] }
 0x209   :  { %1722 = vmatprep.mubr.msk.f32.mxu1 %vm704_vm8, %v685_v33  ;;  %1744 = vmatprep.mubr.msk.f32.mxu0 %vm704_vm8, %v685_v33  ;;  %v1785_v33 = vld [vmem:[%s3066_s3 + $0x90] sm:$0xff] }
 0x20a   :  { %793 = vmatmul.mubr.f32.gmra.mrb[10].mxu1 %v684_v30  ;;  %895 = vmatmul.mubr.f32.gmra.mrb[18].mxu0 %v684_v30  ;;  %v1783_v30 = vld [vmem:[%s3066_s3 + $0x80] sm:$0xff] }
 0x20b   :  { %2191 = vmatpush3.bf16.msra.mxu1 %v2190_v34  ;;  %2215 = vmatpush3.bf16.msra.mxu0 %v2214_v37  ;;  %v2231_v32 = vpack.c.bf16 %v1784_v31, %v1783_v30  ;;  %v1786_v34 = vld [vmem:[%s3066_s3 + $0x98] sm:$0xff]  ;;  %v1238_v37 = vld [vmem:[%s3066_s3 + $0x8] sm:$0xff] }
 0x20c   :  { %2192 = vmatprep.subr.bf16.mxu1 %v2353_v6  ;;  %2216 = vmatprep.subr.bf16.mxu0 %v2353_v6  ;;  %v2235_v35 = vpack.c.bf16 %v1786_v34, %v1785_v33  ;;  %v2941_v38 = vpack.c.bf16 %v1238_v37, %v1237_v36  ;;  %v2243_v33 = vpack.c.bf16 %v1240_v28, %v1239_v27  ;;  %v1242_v36 = vld [vmem:[%s3066_s3 + $0x28] sm:$0xff] }
 0x20d   :  { %1912 = vmatprep.mubr.msk.f32.mxu1 %vm2354_vm9, %v2351_v7  ;;  %1966 = vmatprep.mubr.msk.f32.mxu0 %vm2354_vm9, %v2351_v7 }
 0x20f   :  { %2194 = vmatpush3.bf16.msra.mxu1 %v2193_v40  ;;  %2218 = vmatpush3.bf16.msra.mxu0 %v2217_v44  ;;  %v1540_v40 = vld [vmem:[%s3067_s4 + $0x8] sm:$0xff]  ;;  %v1542_v44 = vld [vmem:[%s3067_s4 + $0x18] sm:$0xff] }
 0x210   :  { %1910 = vmatprep.subr.mxu1 %v2351_v7  ;;  %1964 = vmatprep.subr.mxu0 %v2351_v7  ;;  %v2279_v43 = vpack.c.bf16 %v1540_v40, %v1539_v39  ;;  %v1243_v40 = vld [vmem:[%s3066_s3 + $0x30] sm:$0xff] }
 0x213   :  { %1911 = vmatpush3.msk.msra.mxu1 %vm300_vm2, %v1753_v45  ;;  %1965 = vmatpush3.msk.msra.mxu0 %vm300_vm2, %v1770_v46  ;;  %v2283_v45 = vpack.c.bf16 %v1542_v44, %v1541_v41  ;;  %v1543_v46 = vld [vmem:[%s3067_s4 + $0x20] sm:$0xff]  ;;  %v1244_v41 = vld [vmem:[%s3066_s3 + $0x38] sm:$0xff] }
 0x214   :  { %2195 = vmatprep.subr.bf16.mxu1 %v2353_v6  ;;  %2280 = vmatprep.subr.bf16.mxu0 %v2279_v43  ;;  %v1245_v44 = vld [vmem:[%s3066_s3 + $0x40] sm:$0xff] }
 0x2d5   :  { %v784_v47 = vpop.f32.mrb[6].mxu1  ;;  %v886_v48 = vpop.f32.mrb[14].mxu0 }
 0x2d6   :  { %v900_v49 = vmax.f32 %v784_v47, %v886_v48  ;;  %v786_v50 = vpop.f32.mrb[7].mxu1  ;;  %v888_v51 = vpop.f32.mrb[15].mxu0  ;;  %v1544_v47 = vld [vmem:[%s3067_s4 + $0x28] sm:$0xff] }
 0x2d7   :  { %v2287_v48 = vpack.c.bf16 %v1544_v47, %v1543_v46  ;;  %v1546_v50 = vld [vmem:[%s3067_s4 + $0x38] sm:$0xff]  ;;  %v1791_v46 = vld [vmem:[%s3066_s3 + $0xa0] sm:$0xff]  ;;  %v1792_v47 = vld [vmem:[%s3066_s3 + $0xa8] sm:$0xff] }
 0x2d8   :  { %v925_v60 = vrot.slane %v900_v49, 1  ;;  %v1119_v61 = vrot.slane %v900_v49, 2 }
 0x2d9   :  { %v789_v54 = vpop.f32.mrb[8].mxu1  ;;  %v891_v55 = vpop.f32.mrb[16].mxu0 }
 0x2da   :  { %v901_v56 = vmax.f32 %v789_v54, %v891_v55  ;;  %v791_v57 = vpop.f32.mrb[9].mxu1  ;;  %v893_v58 = vpop.f32.mrb[17].mxu0 }
 0x2dc   :  { %v926_v62 = vrot.slane %v901_v56, 1  ;;  %v1120_v63 = vrot.slane %v901_v56, 2 }
 0x2dd   :  { %v794_v0 = vpop.f32.mrb[10].mxu1  ;;  %v896_v1 = vpop.f32.mrb[18].mxu0 }
 0x2de   :  { %v902_v4 = vmax.f32 %v794_v0, %v896_v1  ;;  %v927_v5 = vsel %vm84_vm0, %v925_v60, %v926_v62  ;;  %v1121_v8 = vsel %vm300_vm2, %v1119_v61, %v1120_v63  ;;  %v796_v9 = vpop.f32.mrb[11].mxu1  ;;  %v898_v10 = vpop.f32.mrb[19].mxu0 }
 0x2df   :  { %1913 = vmatmul.mubr.msk.f32.vlgmr.msra.gmra.mrb[12].mxu1 %vm930_vm10, %v927_v5  ;;  %1967 = vmatmul.mubr.msk.f32.vlgmr.msra.gmra.mrb[20].mxu0 %vm930_vm10, %v1121_v8  ;;  %v1230_v5 = vstv %s1776_s21 }
 0x2e0   :  { %v928_v11 = vrot.slane %v902_v4, 1  ;;  %v1122_v12 = vrot.slane %v902_v4, 2  ;;  %2197 = vmatpush3.bf16.msra.mxu1 %v2196_v59  ;;  %1915 = vmatprep.mubr.msk.f32.mxu1 %vm2354_vm9, %v2351_v7 }
 0x2e1   :  { %2198 = vmatprep.subr.bf16.mxu1 %v2353_v6  ;;  %1969 = vmatprep.mubr.msk.f32.mxu0 %vm2354_vm9, %v2351_v7 }
 0x2e2   :  { %v929_v16 = vsel %vm84_vm0, %v926_v62, %v928_v11  ;;  %v1123_v17 = vsel %vm300_vm2, %v1120_v63, %v1122_v12  ;;  %2282 = vmatpush3.bf16.msra.mxu0 %v2279_v43  ;;  %v2251_v43 = vpack.c.bf16 %v1244_v41, %v1243_v40 }
 0x2e3   :  { %1916 = vmatmul.mubr.msk.f32.gmra.mrb[14].mxu1 %vm930_vm10, %v929_v16  ;;  %1970 = vmatmul.mubr.msk.f32.gmra.mrb[22].mxu0 %vm930_vm10, %v1123_v17 }
 0x2e4   :  { %2200 = vmatpush3.bf16.msra.mxu1 %v2199_v13  ;;  %1918 = vmatprep.mubr.msk.f32.mxu1 %vm2354_vm9, %v2351_v7 }
 0x2e5   :  { %2201 = vmatprep.subr.bf16.mxu1 %v2353_v6  ;;  %1972 = vmatprep.mubr.msk.f32.mxu0 %vm2354_vm9, %v2351_v7 }
 0x2e6   :  { %2284 = vmatprep.subr.bf16.mxu0 %v2283_v45 }
 0x2e7   :  { %1919 = vmatmul.mubr.msk.f32.gmra.mrb[16].mxu1 %vm930_vm10, %v928_v11  ;;  %1973 = vmatmul.mubr.msk.f32.gmra.mrb[24].mxu0 %vm930_vm10, %v1122_v12 }
 0x2e8   :  { %2203 = vmatpush3.bf16.msra.mxu1 %v2202_v18  ;;  %1939 = vmatprep.mubr.msk.f32.mxu1 %vm2354_vm9, %v2351_v7 }
 0x2e9   :  { %2204 = vmatprep.subr.bf16.mxu1 %v2353_v6  ;;  %v1777_v6 = vld [vmem:[%s3066_s3 + $0x50] sm:$0xff]  ;;  %2286 = vmatpush3.bf16.msra.mxu0 %v2283_v45 }
 0x2ea   :  { %v2219_v24 = vpack.c.bf16 %v1778_v23, %v1777_v6  ;;  %2288 = vmatprep.subr.bf16.mxu0 %v2287_v48 }
 0x2ec   :  { %2206 = vmatpush3.bf16.msra.mxu1 %v2205_v21 }
 0x2ed   :  { %1937 = vmatprep.subr.mxu1 %v2351_v7  ;;  %2290 = vmatpush3.bf16.msra.mxu0 %v2287_v48  ;;  %v2259_v48 = vpack.c.bf16 %v1792_v47, %v1791_v46 }
 0x2f0   :  { %1938 = vmatpush3.msk.msra.mxu1 %vm300_vm2, %v911_v22 }
 0x2f1   :  { %1940 = vmatmul.mubr.msk.f32.vlgmr.msra.gmra.mrb[18].mxu1 %vm930_vm10, %v900_v49  ;;  %2220 = vmatprep.subr.bf16.mxu1 %v2219_v24  ;;  %v1545_v49 = vld [vmem:[%s3067_s4 + $0x30] sm:$0xff] }
 0x2f2   :  { %1942 = vmatprep.mubr.msk.f32.mxu1 %vm2354_vm9, %v2351_v7  ;;  %2222 = vmatpush3.bf16.msra.mxu1 %v2219_v24  ;;  %v2291_v51 = vpack.c.bf16 %v1546_v50, %v1545_v49  ;;  %v1793_v49 = vld [vmem:[%s3066_s3 + $0xb0] sm:$0xff]  ;;  %v1794_v50 = vld [vmem:[%s3066_s3 + $0xb8] sm:$0xff] }
 0x2f4   :  { %2292 = vmatprep.subr.bf16.mxu0 %v2291_v51 }
 0x2f5   :  { %1943 = vmatmul.mubr.msk.f32.gmra.mrb[20].mxu1 %vm930_vm10, %v901_v56  ;;  %2294 = vmatpush3.bf16.msra.mxu0 %v2291_v51  ;;  %v2263_v51 = vpack.c.bf16 %v1794_v50, %v1793_v49 }
 0x2f6   :  { %1945 = vmatprep.mubr.msk.f32.mxu1 %vm2354_vm9, %v2351_v7  ;;  %v1780_v7 = vld [vmem:[%s3066_s3 + $0x68] sm:$0xff] }
 0x2f7   :  { %v2223_v26 = vpack.c.bf16 %v1780_v7, %v1779_v25 }
 0x2f9   :  { %1946 = vmatmul.mubr.msk.f32.gmra.mrb[22].mxu1 %vm930_vm10, %v902_v4  ;;  %2224 = vmatprep.subr.bf16.mxu1 %v2223_v26 }
 0x2fa   :  { %2226 = vmatpush3.bf16.msra.mxu1 %v2223_v26 }
 0x2fb   :  { %2228 = vmatprep.subr.bf16.mxu1 %v2227_v29 }
 0x2fe   :  { %2230 = vmatpush3.bf16.msra.mxu1 %v2227_v29 }
 0x2ff   :  { %2232 = vmatprep.subr.bf16.mxu1 %v2231_v32 }
 0x302   :  { %2234 = vmatpush3.bf16.msra.mxu1 %v2231_v32 }
 0x303   :  { %2236 = vmatprep.subr.bf16.mxu1 %v2235_v35 }
 0x306   :  { %2238 = vmatpush3.bf16.msra.mxu1 %v2235_v35  ;;  %v1241_v35 = vld [vmem:[%s3066_s3 + $0x20] sm:$0xff] }
 0x307   :  { %2240 = vmatprep.subr.bf16.mxu1 %v2941_v38  ;;  %v2247_v39 = vpack.c.bf16 %v1242_v36, %v1241_v35 }
 0x3b2   :  { %v1006_v52 = vpop.f32.mrb[12].mxu1  ;;  %v1199_v53 = vpop.f32.mrb[20].mxu0 }
 0x3b3   :  { %v1914_v54 = vpop.f32.mrb[13].mxu1  ;;  %v1968_v55 = vpop.f32.mrb[21].mxu0 }
 0x3b4   :  { %v1797_v55 = vld [vmem:[%s3066_s3 + $0xd0] sm:$0xff] }
 0x3b6   :  { %v1011_v56 = vpop.f32.mrb[14].mxu1  ;;  %v1204_v57 = vpop.f32.mrb[22].mxu0 }
 0x3b7   :  { %v1917_v58 = vpop.f32.mrb[15].mxu1  ;;  %v1971_v59 = vpop.f32.mrb[23].mxu0 }
 0x3b8   :  { %v1799_v58 = vld [vmem:[%s3066_s3 + $0xe0] sm:$0xff]  ;;  %v1800_v59 = vld [vmem:[%s3066_s3 + $0xe8] sm:$0xff] }
 0x3ba   :  { %v1016_v60 = vpop.f32.mrb[16].mxu1  ;;  %v1209_v61 = vpop.f32.mrb[24].mxu0 }
 0x3bb   :  { %v1920_v62 = vpop.f32.mrb[17].mxu1  ;;  %v1974_v63 = vpop.f32.mrb[25].mxu0 }
 0x3bc   :  { %v1548_v62 = vld [vmem:[%s3067_s4 + $0x48] sm:$0xff] }
 0x3c4   :  { %v1095_v0 = vpop.f32.mrb[18].mxu1 }
 0x3c5   :  { %v1096_v1 = vadd.f32 %v1095_v0, %v1006_v52  ;;  %v1941_v2 = vpop.f32.mrb[19].mxu1  ;;  %v1795_v52 = vld [vmem:[%s3066_s3 + $0xc0] sm:$0xff]  ;;  %v1549_v0 = vld [vmem:[%s3067_s4 + $0x50] sm:$0xff] }
 0x3c7   :  { %v1213_v4 = vadd.f32 %v1199_v53, %v1096_v1  ;;  %v1796_v53 = vld [vmem:[%s3066_s3 + $0xc8] sm:$0xff]  ;;  %v1550_v1 = vld [vmem:[%s3067_s4 + $0x58] sm:$0xff] }
 0x3c8   :  { %v1100_v8 = vpop.f32.mrb[20].mxu1  ;;  %v2267_v54 = vpack.c.bf16 %v1796_v53, %v1795_v52  ;;  %v2299_v2 = vpack.c.bf16 %v1550_v1, %v1549_v0 }
 0x3c9   :  { %v1223_v9 = vadd.f32 %v1775_v3, %v1213_v4  ;;  %v1101_v10 = vadd.f32 %v1100_v8, %v1011_v56  ;;  %v1944_v11 = vpop.f32.mrb[21].mxu1  ;;  %v1798_v56 = vld [vmem:[%s3066_s3 + $0xd8] sm:$0xff] }
 0x3cb   :  { %v1231_v12 = vmul.f32 %v1230_v5, %v1223_v9  ;;  %v1214_v13 = vadd.f32 %v1204_v57, %v1101_v10  ;;  %vm1227_vm11 = vcmp.ge.f32.partialorder %v1223_v9, 0.0  ;;  %v2271_v57 = vpack.c.bf16 %v1798_v56, %v1797_v55 }
 0x3cc   :  { %v1105_v14 = vpop.f32.mrb[22].mxu1 }
 0x3cd   :  { %v1224_v15 = vadd.f32 %v1775_v3, %v1214_v13  ;;  %v1106_v16 = vadd.f32 %v1105_v14, %v1016_v60  ;;  %v1947_v17 = vpop.f32.mrb[23].mxu1  ;;  %v1234_v18 = vsel %vm1227_vm11, %v1223_v9, %v1231_v12  ;;  %v2275_v60 = vpack.c.bf16 %v1800_v59, %v1799_v58 }
 0x3ce   :  { %v1261_v6 = vrot.slane %v1234_v18, 1  ;;  %v1436_v24 = vrot.slane %v1234_v18, 2 }
 0x3cf   :  { %vm1228_vm12 = vcmp.ge.f32.partialorder %v1224_v15, 0.0  ;;  %v1232_v19 = vmul.f32 %v1230_v5, %v1224_v15  ;;  %v1215_v20 = vadd.f32 %v1209_v61, %v1106_v16  ;;  %v1547_v61 = vld [vmem:[%s3067_s4 + $0x40] sm:$0xff] }
 0x3d0   :  { %v2295_v63 = vpack.c.bf16 %v1548_v62, %v1547_v61 }
 0x3d1   :  { %v1235_v21 = vsel %vm1228_vm12, %v1224_v15, %v1232_v19  ;;  %v1225_v22 = vadd.f32 %v1775_v3, %v1215_v20  ;;  %v1803_v3 = vld [vmem:[%s3071_s8] ss:$0 sm:$0xff] }
 0x3d2   :  { %v1262_v23 = vrot.slane %v1235_v21, 1  ;;  %v1437_v25 = vrot.slane %v1235_v21, 2  ;;  %2296 = vmatprep.subr.bf16.mxu0 %v2295_v63  ;;  %v1805_v15 = vld [vmem:[%s3072_s9] ss:$0 sm:$0xff] }
 0x3d3   :  { %vm1229_vm14 = vcmp.ge.f32.partialorder %v1225_v22, 0.0  ;;  %v1233_v7 = vmul.f32 %v1230_v5, %v1225_v22  ;;  %2298 = vmatpush3.bf16.msra.mxu0 %v2295_v63  ;;  %v1534_v5 = vstv %s1804_s16 }
 0x3d4   :  { %v1263_v26 = vsel %vm84_vm0, %v1261_v6, %v1262_v23  ;;  %v1438_v29 = vsel %vm300_vm2, %v1436_v24, %v1437_v25  ;;  %2300 = vmatprep.subr.bf16.mxu0 %v2299_v2 }
 0x3d5   :  { %v1236_v30 = vsel %vm1229_vm14, %v1225_v22, %v1233_v7  ;;  %1995 = vmatprep.mubr.msk.f32.mxu1 %vm1266_vm13, %v1263_v26 }
 0x3d6   :  { %v1264_v31 = vrot.slane %v1236_v30, 1  ;;  %v1439_v32 = vrot.slane %v1236_v30, 2 }
 0x3d7   :  { %2302 = vmatpush3.bf16.msra.mxu0 %v2299_v2 }
 0x3d8   :  { %v1265_v34 = vsel %vm84_vm0, %v1262_v23, %v1264_v31  ;;  %v1440_v37 = vsel %vm300_vm2, %v1437_v25, %v1439_v32 }
 0x3d9   :  { %1996 = vmatmul.mubr.msk.f32.vlgmr.msra.gmra.mrb[24].mxu1 %vm1266_vm13, %v1265_v34 }
 0x3da   :  { %2242 = vmatpush3.bf16.msra.mxu1 %v2941_v38  ;;  %2018 = vmatprep.mubr.msk.f32.mxu1 %vm1266_vm13, %v1234_v18  ;;  %v1246_v38 = vld [vmem:[%s3066_s3 + $0x48] sm:$0xff] }
 0x3db   :  { %2244 = vmatprep.subr.bf16.mxu1 %v2243_v33  ;;  %v2255_v45 = vpack.c.bf16 %v1246_v38, %v1245_v44 }
 0x3de   :  { %2246 = vmatpush3.bf16.msra.mxu1 %v2243_v33 }
 0x3df   :  { %2248 = vmatprep.subr.bf16.mxu1 %v2247_v39 }
 0x3e2   :  { %2250 = vmatpush3.bf16.msra.mxu1 %v2247_v39 }
 0x3e3   :  { %2252 = vmatprep.subr.bf16.mxu1 %v2251_v43 }
 0x3e6   :  { %2254 = vmatpush3.bf16.msra.mxu1 %v2251_v43 }
 0x3e7   :  { %2256 = vmatprep.subr.bf16.mxu1 %v2255_v45 }
 0x3ea   :  { %2258 = vmatpush3.bf16.msra.mxu1 %v2255_v45 }
 0x3eb   :  { %2260 = vmatprep.subr.bf16.mxu1 %v2259_v48 }
 0x3ed   :  { %2019 = vmatmul.mubr.msk.f32.vlgmr.msra.gmra.mrb[24].mxu1 %vm1266_vm13, %v1235_v21 }
 0x3ee   :  { %2262 = vmatpush3.bf16.msra.mxu1 %v2259_v48  ;;  %2041 = vmatprep.mubr.msk.f32.mxu1 %vm1266_vm13, %v1438_v29 }
 0x3ef   :  { %2264 = vmatprep.subr.bf16.mxu1 %v2263_v51 }
 0x3f2   :  { %2266 = vmatpush3.bf16.msra.mxu1 %v2263_v51 }
 0x3f3   :  { %2268 = vmatprep.subr.bf16.mxu1 %v2267_v54 }
 0x3f6   :  { %2270 = vmatpush3.bf16.msra.mxu1 %v2267_v54 }
 0x3f7   :  { %2272 = vmatprep.subr.bf16.mxu1 %v2271_v57 }
 0x3fa   :  { %2274 = vmatpush3.bf16.msra.mxu1 %v2271_v57 }
 0x3fb   :  { %2276 = vmatprep.subr.bf16.mxu1 %v2275_v60 }
 0x3fe   :  { %2278 = vmatpush3.bf16.msra.mxu1 %v2275_v60 }
 0x401   :  { %2042 = vmatmul.mubr.msk.f32.vlgmr.msra.gmra.mrb[24].mxu1 %vm1266_vm13, %v1440_v37 }
 0x4d4   :  { %v2043_v4 = vpop.f32.mrb[24].mxu1 }
 0x4d5   :  { %v1530_v8 = vadd.f32 %v2043_v4, %v1803_v3  ;;  %v1511_v9 = vpop.f32.mrb[25].mxu1 }
 0x4d6   :  { %v1529_v10 = vadd.f32 %v1803_v3, %v1511_v9 }
 0x4d7   :  { %v1536_v11 = vmul.f32 %v1534_v5, %v1530_v8  ;;  %vm1533_vm0 = vcmp.ge.f32.partialorder %v1530_v8, 0.0 }
 0x4d8   :  { %vm1532_vm2 = vcmp.ge.f32.partialorder %v1529_v10, 0.0  ;;  %v1535_v12 = vmul.f32 %v1534_v5, %v1529_v10 }
 0x4d9   :  { %v1538_v14 = vsel %vm1533_vm0, %v1530_v8, %v1536_v11 }
 0x4da   :  { %v1537_v13 = vsel %vm1532_vm2, %v1529_v10, %v1535_v12 }
 0x4db   :  { %2068 = vmatprep.mubr.msk.f32.mxu0 %vm1558_vm15, %v1537_v13 }
 0x4dc   :  { %2069 = vmatmul.mubr.msk.f32.vlgmr.msra.gmra.mrb[26].mxu0 %vm1558_vm15, %v1538_v14 }
 0x5af   :  { %v2070_v16 = vpop.f32.mrb[26].mxu0 }
 0x5b0   :  { %v1637_v17 = vadd.f32 %v2070_v16, %v1805_v15  ;;  %v1631_v18 = vpop.f32.mrb[27].mxu0 }
 0x5b1   :  { %v1632_v19 = vadd.f32 %v1805_v15, %v1631_v18 }
 0x5b2   :  { %v1646_v20 = vsub.f32 0.0, %v1637_v17 }
 0x5b3   :  { %v1645_v21 = vsub.f32 0.0, %v1632_v19 }
 0x5b4   :  { %v1649_v22 = vmul.f32 1.442695, %v1646_v20 }
 0x5b5   :  { %v1647_v6 = vmul.f32 1.442695, %v1645_v21 }
 0x5b6   :  { %2328 = vpow2.f32 %v1649_v22 }
 0x5b7   :  { %2330 = vpow2.f32 %v1647_v6 }
 0x5c0   :  { %v2329_v23 = vpop.eup %2328 }
 0x5c1   :  { %v2331_v24 = vpop.eup %2330  ;;  %v1652_v25 = vadd.f32 1.0, %v2329_v23 }
 0x5c2   :  { %v1651_v7 = vadd.f32 1.0, %v2331_v24 }
 0x5c3   :  { %2332 = vrcp.f32 %v1652_v25 }
 0x5c4   :  { %2334 = vrcp.f32 %v1651_v7 }
 0x5cd   :  { %v2333_v26 = vpop.eup %2332 }
 0x5ce   :  { %v2335_v27 = vpop.eup %2334  ;;  %v1658_v28 = vsel %vm1644_vm6, %v2333_v26, %v1637_v17 }
 0x5cf   :  { %1661 = vst.msk [vmem:[%s3074_s11 + $0x8] sm:$0xff] %vm1659_vm7, %v1658_v28  ;;  %v1657_v29 = vsel %vm1644_vm6, %v2335_v27, %v1632_v19 }
 0x5d0   :  { %1660 = vst.msk [vmem:[%s3074_s11] sm:$0xff] %vm1659_vm7, %v1657_v29 }
 0x5d1   :  { %1666 = vsyncpa [#allocation3], 1 }

</bundles_post_ra>
